<compile_context>
chip_gen: v5e
topology: v5e:2x2
jax: 0.10.0
libtpu: 0.0.40
codegen_flags: <defaults>
</compile_context>

<pallas_src>
import math
import functools

import jax
import jax.numpy as jnp
from jax.experimental import pallas as pl
from jax.experimental.pallas import tpu as pltpu


# ----------------------------- model config ---------------------------------
DIM = 128          # args.dim
N_HEADS = 4        # args.n_heads
N_KV_HEADS = 2     # args.n_kv_heads (GQA)
HEAD_DIM = DIM // N_HEADS          # 32
N_REP = N_HEADS // N_KV_HEADS      # 2
MULTIPLE_OF = 64
NORM_EPS = 1e-5
ROPE_THETA = 500000.0

SEQ = 8
BATCH = 2


def _ffn_hidden_dim(dim, multiple_of, ffn_dim_multiplier=None):
    hidden = 4 * dim
    hidden = int(2 * hidden / 3)
    if ffn_dim_multiplier is not None:
        hidden = int(ffn_dim_multiplier * hidden)
    return multiple_of * ((hidden + multiple_of - 1) // multiple_of)


HIDDEN = _ffn_hidden_dim(DIM, MULTIPLE_OF)  # 384


# ------------------------------- kernel -------------------------------------
def _transformer_block_kernel(
    x_ref, mask_ref,
    cos_q_ref, sina_q_ref, sinb_q_ref,
    cos_k_ref, sina_k_ref, sinb_k_ref,
    wqkv_ref, wo_ref, w13_ref, w2_ref,
    attn_norm_ref, ffn_norm_ref,
    o_ref,
    *, n_heads, n_kv_heads, head_dim, hidden, eps,
):
    n_rep = n_heads // n_kv_heads
    d_model = n_heads * head_dim
    d_kv = n_kv_heads * head_dim

    x = x_ref[...]                                            # (R, D) f32, R = B*S

    # ---- attention RMSNorm (f32 elementwise) --------------------------------
    ms = jnp.mean(x * x, axis=-1, keepdims=True)
    xn = x * jax.lax.rsqrt(ms + eps) * attn_norm_ref[...]
    xn_bf = xn.astype(jnp.bfloat16)

    # ---- fused QKV projection (bf16 MXU, f32 accumulation) ------------------
    # wqkv = [wq/sqrt(hd) | wk | wv]  -> (R, D + 2*DKV)
    qkv = jnp.dot(xn_bf, wqkv_ref[...], preferred_element_type=jnp.float32)

    xq = qkv[:, :d_model]                                     # (R, D)
    xk = qkv[:, d_model:d_model + d_kv]                       # (R, DKV)

    # ---- RoPE: interleaved-pair complex rotation via lane rolls -------------
    # out[2j]   = a*cos - b*sin   (sin_a = -sin on even lanes, 0 on odd)
    # out[2j+1] = b*cos + a*sin   (sin_b = +sin on odd lanes,  0 on even)
    # Parity selection is pre-baked into sin_a / sin_b in the wrapper; valid
    # because head_dim is even so pairs never straddle head boundaries and the
    # cyclic-wrap lanes are multiplied by zero.
    def rope(t, cos, sin_a, sin_b):
        n = t.shape[-1]
        return (t * cos
                + pltpu.roll(t, shift=n - 1, axis=1) * sin_a    # t[:, j+1]
                + pltpu.roll(t, shift=1, axis=1) * sin_b)       # t[:, j-1]

    xq = rope(xq, cos_q_ref[...], sina_q_ref[...], sinb_q_ref[...])
    xk = rope(xk, cos_k_ref[...], sina_k_ref[...], sinb_k_ref[...])

    # ---- head-batched GQA attention (heads on the leading batch dim) --------
    q_heads = jnp.stack(
        [xq[:, h * head_dim:(h + 1) * head_dim] for h in range(n_heads)], axis=0
    ).astype(jnp.bfloat16)                                    # (H, R, hd)
    k_g = [xk[:, g * head_dim:(g + 1) * head_dim] for g in range(n_kv_heads)]
    v_g = [qkv[:, d_model + d_kv + g * head_dim:
                 d_model + d_kv + (g + 1) * head_dim] for g in range(n_kv_heads)]
    # GQA repeat_interleave: q head h uses kv head h // n_rep (slice reused, no copy op)
    k_heads = jnp.stack([k_g[h // n_rep] for h in range(n_heads)], axis=0
                        ).astype(jnp.bfloat16)                # (H, R, hd)
    v_heads = jnp.stack([v_g[h // n_rep] for h in range(n_heads)], axis=0
                        ).astype(jnp.bfloat16)                # (H, R, hd)

    # scores: scale already folded into wq; mask is block-diag(batch) * causal
    s = jnp.einsum('hqd,hkd->hqk', q_heads, k_heads,
                   preferred_element_type=jnp.float32)        # (H, R, R) f32
    s = s + mask_ref[...][None, :, :]
    s = s - jnp.max(s, axis=-1, keepdims=True)
    p = jnp.exp(s)
    p = p * pl.reciprocal(jnp.sum(p, axis=-1, keepdims=True), approx=True)

    o3 = jnp.einsum('hqk,hkd->hqd', p.astype(jnp.bfloat16), v_heads,
                    preferred_element_type=jnp.float32)       # (H, R, hd) f32
    attn = jnp.concatenate([o3[h] for h in range(n_heads)], axis=-1)  # (R, D)

    attn_out = jnp.dot(attn.astype(jnp.bfloat16), wo_ref[...],
                       preferred_element_type=jnp.float32)
    h_res = x + attn_out                                      # first residual

    # ---- FFN RMSNorm + SwiGLU (fused w1|w3) ----------------------------------
    ms2 = jnp.mean(h_res * h_res, axis=-1, keepdims=True)
    hn = h_res * jax.lax.rsqrt(ms2 + eps) * ffn_norm_ref[...]
    h13 = jnp.dot(hn.astype(jnp.bfloat16), w13_ref[...],
                  preferred_element_type=jnp.float32)         # (R, 2*HIDDEN)
    a = h13[:, :hidden]
    b = h13[:, hidden:]
    g = (a * jax.nn.sigmoid(a)) * b                           # silu(w1 x) * w3 x, f32
    ff = jnp.dot(g.astype(jnp.bfloat16), w2_ref[...],
                 preferred_element_type=jnp.float32)          # (R, D)

    o_ref[...] = h_res + ff                                   # second residual


# ------------------------------ wrapper --------------------------------------
def transformer_block(x, mask, rope_q, rope_k, params):
    """x: (B, S, D) f32. mask: (B*S, B*S) f32 block-diag causal. rope_*: (cos, sin_a, sin_b)."""
    B, S, D = x.shape
    R = B * S

    kernel = functools.partial(
        _transformer_block_kernel,
        n_heads=N_HEADS, n_kv_heads=N_KV_HEADS, head_dim=HEAD_DIM,
        hidden=HIDDEN, eps=NORM_EPS,
    )

    # Tiny shapes: single kernel invocation, all operands resident in VMEM
    # (no grid -> no per-step pipeline overhead; batch folded into rows).
    out = pl.pallas_call(
        kernel,
        out_shape=jax.ShapeDtypeStruct((R, D), jnp.float32),
    )(
        x.reshape(R, D), mask,
        rope_q[0], rope_q[1], rope_q[2],
        rope_k[0], rope_k[1], rope_k[2],
        params["wqkv"], params["wo"], params["w13"], params["w2"],
        params["attn_norm"], params["ffn_norm"],
    )
    return out.reshape(B, S, D)


# --------------------------- param / rope / mask setup -----------------------
def init_params(key):
    ks = jax.random.split(key, 7)
    scale = 0.05
    DKV = N_KV_HEADS * HEAD_DIM
    wq = scale * jax.random.normal(ks[0], (DIM, DIM), jnp.float32)
    wk = scale * jax.random.normal(ks[1], (DIM, DKV), jnp.float32)
    wv = scale * jax.random.normal(ks[2], (DIM, DKV), jnp.float32)
    wo = scale * jax.random.normal(ks[3], (DIM, DIM), jnp.float32)
    w1 = scale * jax.random.normal(ks[4], (DIM, HIDDEN), jnp.float32)
    w2 = scale * jax.random.normal(ks[5], (HIDDEN, DIM), jnp.float32)
    w3 = scale * jax.random.normal(ks[6], (DIM, HIDDEN), jnp.float32)

    # fold 1/sqrt(head_dim) into wq (RoPE is linear, so pre-scaling commutes),
    # pack fused matmuls, store MXU weights as bf16 (halves weight DMA bytes).
    wq = wq / math.sqrt(HEAD_DIM)
    return {
        "wqkv": jnp.concatenate([wq, wk, wv], axis=1).astype(jnp.bfloat16),  # (D, D+2*DKV)
        "wo": wo.astype(jnp.bfloat16),                                       # (D, D)
        "w13": jnp.concatenate([w1, w3], axis=1).astype(jnp.bfloat16),       # (D, 2*HIDDEN)
        "w2": w2.astype(jnp.bfloat16),                                       # (HIDDEN, D)
        "attn_norm": jnp.ones((1, DIM), jnp.float32),
        "ffn_norm": jnp.ones((1, DIM), jnp.float32),
    }


def precompute_rope(batch, seq_len, head_dim, theta, start_pos=0):
    # matches llama precompute_freqs_cis; cos/sin repeated per interleaved pair,
    # parity selection baked into sin_a / sin_b, rows tiled for the folded batch.
    freqs = 1.0 / (theta ** (jnp.arange(0, head_dim, 2, dtype=jnp.float32) / head_dim))
    t = jnp.arange(start_pos, start_pos + seq_len, dtype=jnp.float32)
    ang = jnp.outer(t, freqs)                                  # (S, hd/2)
    cos = jnp.repeat(jnp.cos(ang), 2, axis=-1)                 # (S, hd) interleaved
    sin = jnp.repeat(jnp.sin(ang), 2, axis=-1)
    even = (jnp.arange(head_dim) % 2) == 0
    sin_a = jnp.where(even, -sin, 0.0)                         # multiplies t[:, j+1]
    sin_b = jnp.where(even, 0.0, sin)                          # multiplies t[:, j-1]

    def tile(a, n_h):
        return jnp.tile(a, (batch, n_h)).astype(jnp.float32)   # (B*S, n_h*hd)

    rope_q = (tile(cos, N_HEADS), tile(sin_a, N_HEADS), tile(sin_b, N_HEADS))
    rope_k = (tile(cos, N_KV_HEADS), tile(sin_a, N_KV_HEADS), tile(sin_b, N_KV_HEADS))
    return rope_q, rope_k


def build_mask(batch, seq_len):
    # block-diagonal (no cross-batch attention) causal mask for the folded (B*S) rows
    r = jnp.arange(batch * seq_len)
    same_batch = (r[:, None] // seq_len) == (r[None, :] // seq_len)
    causal = (r[None, :] % seq_len) <= (r[:, None] % seq_len)
    return jnp.where(same_batch & causal, 0.0, -1e9).astype(jnp.float32)


if __name__ == "__main__":
    key = jax.random.PRNGKey(0)
    k_x, k_p = jax.random.split(key)

    x = jax.random.normal(k_x, (BATCH, SEQ, DIM), jnp.float32)
    params = init_params(k_p)
    mask = build_mask(BATCH, SEQ)
    rope_q, rope_k = precompute_rope(BATCH, SEQ, HEAD_DIM, ROPE_THETA, start_pos=0)

    out = transformer_block(x, mask, rope_q, rope_k, params)
    out = jax.block_until_ready(out)
    assert out.shape == (BATCH, SEQ, DIM) and out.dtype == jnp.float32
    assert bool(jnp.all(jnp.isfinite(out)))
    print("KERNEL_OK")
</pallas_src>

<mosaic_0001>
module attributes {stable_mosaic.version = 11 : i64} {
  func.func @_transformer_block_kernel(%arg0: memref<16x128xf32, #tpu.memory_space<vmem>>, %arg1: memref<16x16xf32, #tpu.memory_space<vmem>>, %arg2: memref<16x128xf32, #tpu.memory_space<vmem>>, %arg3: memref<16x128xf32, #tpu.memory_space<vmem>>, %arg4: memref<16x128xf32, #tpu.memory_space<vmem>>, %arg5: memref<16x64xf32, #tpu.memory_space<vmem>>, %arg6: memref<16x64xf32, #tpu.memory_space<vmem>>, %arg7: memref<16x64xf32, #tpu.memory_space<vmem>>, %arg8: memref<128x256xbf16, #tpu.memory_space<vmem>>, %arg9: memref<128x128xbf16, #tpu.memory_space<vmem>>, %arg10: memref<128x768xbf16, #tpu.memory_space<vmem>>, %arg11: memref<384x128xbf16, #tpu.memory_space<vmem>>, %arg12: memref<1x128xf32, #tpu.memory_space<vmem>>, %arg13: memref<1x128xf32, #tpu.memory_space<vmem>>, %arg14: memref<16x128xf32, #tpu.memory_space<vmem>>) attributes {dimension_semantics = [], scalar_prefetch = 0 : i64, scratch_operands = 0 : i64, tpu.core_type = #tpu.core_type<tc>} {
    %c0 = arith.constant 0 : index
    %c0_0 = arith.constant 0 : index
    %0 = vector.load %arg0[%c0, %c0_0] : memref<16x128xf32, #tpu.memory_space<vmem>>, vector<16x128xf32>
    %1 = arith.mulf %0, %0 : vector<16x128xf32>
    %cst = arith.constant dense<0.000000e+00> : vector<16xf32>
    %2 = vector.multi_reduction <add>, %1, %cst [1] : vector<16x128xf32> to vector<16xf32>
    %3 = vector.shape_cast %2 : vector<16xf32> to vector<16x1xf32>
    %cst_1 = arith.constant 1.280000e+02 : f32
    %4 = vector.broadcast %cst_1 : f32 to vector<16x1xf32>
    %5 = arith.divf %3, %4 : vector<16x1xf32>
    %cst_2 = arith.constant 9.99999974E-6 : f32
    %6 = vector.broadcast %cst_2 : f32 to vector<16x1xf32>
    %7 = arith.addf %5, %6 : vector<16x1xf32>
    %8 = math.rsqrt %7 : vector<16x1xf32>
    %9 = vector.broadcast %8 : vector<16x1xf32> to vector<16x128xf32>
    %10 = arith.mulf %0, %9 : vector<16x128xf32>
    %c0_3 = arith.constant 0 : index
    %c0_4 = arith.constant 0 : index
    %11 = vector.load %arg12[%c0_3, %c0_4] : memref<1x128xf32, #tpu.memory_space<vmem>>, vector<1x128xf32>
    %12 = vector.broadcast %11 : vector<1x128xf32> to vector<16x128xf32>
    %13 = arith.mulf %10, %12 : vector<16x128xf32>
    %14 = arith.truncf %13 : vector<16x128xf32> to vector<16x128xbf16>
    %c0_5 = arith.constant 0 : index
    %c0_6 = arith.constant 0 : index
    %15 = vector.load %arg8[%c0_5, %c0_6] : memref<128x256xbf16, #tpu.memory_space<vmem>>, vector<128x256xbf16>
    %cst_7 = arith.constant dense<0.000000e+00> : vector<16x256xf32>
    %16 = tpu.matmul %14, %15, %cst_7 {dimension_numbers = #tpu.dot_dimension_numbers<[1], [0], [0], [1], [0, 0, 1, 1], [], []>} : vector<16x128xbf16>, vector<128x256xbf16>, vector<16x256xf32> -> vector<16x256xf32>
    %17 = vector.extract_strided_slice %16 {offsets = [0, 0], sizes = [16, 128], strides = [1, 1]} : vector<16x256xf32> to vector<16x128xf32>
    %18 = vector.extract_strided_slice %16 {offsets = [0, 128], sizes = [16, 64], strides = [1, 1]} : vector<16x256xf32> to vector<16x64xf32>
    %c0_8 = arith.constant 0 : index
    %c0_9 = arith.constant 0 : index
    %19 = vector.load %arg2[%c0_8, %c0_9] : memref<16x128xf32, #tpu.memory_space<vmem>>, vector<16x128xf32>
    %c0_10 = arith.constant 0 : index
    %c0_11 = arith.constant 0 : index
    %20 = vector.load %arg3[%c0_10, %c0_11] : memref<16x128xf32, #tpu.memory_space<vmem>>, vector<16x128xf32>
    %c0_12 = arith.constant 0 : index
    %c0_13 = arith.constant 0 : index
    %21 = vector.load %arg4[%c0_12, %c0_13] : memref<16x128xf32, #tpu.memory_space<vmem>>, vector<16x128xf32>
    %22 = arith.mulf %17, %19 : vector<16x128xf32>
    %c127_i32 = arith.constant 127 : i32
    %23 = tpu.dynamic_rotate %17 by %c127_i32 dim 1 : vector<16x128xf32>, i32 -> vector<16x128xf32>
    %24 = arith.mulf %23, %20 : vector<16x128xf32>
    %25 = arith.addf %22, %24 : vector<16x128xf32>
    %c1_i32 = arith.constant 1 : i32
    %26 = tpu.dynamic_rotate %17 by %c1_i32 dim 1 : vector<16x128xf32>, i32 -> vector<16x128xf32>
    %27 = arith.mulf %26, %21 : vector<16x128xf32>
    %28 = arith.addf %25, %27 : vector<16x128xf32>
    %c0_14 = arith.constant 0 : index
    %c0_15 = arith.constant 0 : index
    %29 = vector.load %arg5[%c0_14, %c0_15] : memref<16x64xf32, #tpu.memory_space<vmem>>, vector<16x64xf32>
    %c0_16 = arith.constant 0 : index
    %c0_17 = arith.constant 0 : index
    %30 = vector.load %arg6[%c0_16, %c0_17] : memref<16x64xf32, #tpu.memory_space<vmem>>, vector<16x64xf32>
    %c0_18 = arith.constant 0 : index
    %c0_19 = arith.constant 0 : index
    %31 = vector.load %arg7[%c0_18, %c0_19] : memref<16x64xf32, #tpu.memory_space<vmem>>, vector<16x64xf32>
    %32 = arith.mulf %18, %29 : vector<16x64xf32>
    %c63_i32 = arith.constant 63 : i32
    %33 = tpu.dynamic_rotate %18 by %c63_i32 dim 1 : vector<16x64xf32>, i32 -> vector<16x64xf32>
    %34 = arith.mulf %33, %30 : vector<16x64xf32>
    %35 = arith.addf %32, %34 : vector<16x64xf32>
    %c1_i32_20 = arith.constant 1 : i32
    %36 = tpu.dynamic_rotate %18 by %c1_i32_20 dim 1 : vector<16x64xf32>, i32 -> vector<16x64xf32>
    %37 = arith.mulf %36, %31 : vector<16x64xf32>
    %38 = arith.addf %35, %37 : vector<16x64xf32>
    %39 = vector.extract_strided_slice %28 {offsets = [0, 0], sizes = [16, 32], strides = [1, 1]} : vector<16x128xf32> to vector<16x32xf32>
    %40 = vector.extract_strided_slice %28 {offsets = [0, 32], sizes = [16, 32], strides = [1, 1]} : vector<16x128xf32> to vector<16x32xf32>
    %41 = vector.extract_strided_slice %28 {offsets = [0, 64], sizes = [16, 32], strides = [1, 1]} : vector<16x128xf32> to vector<16x32xf32>
    %42 = vector.extract_strided_slice %28 {offsets = [0, 96], sizes = [16, 32], strides = [1, 1]} : vector<16x128xf32> to vector<16x32xf32>
    %43 = vector.shape_cast %39 : vector<16x32xf32> to vector<1x16x32xf32>
    %44 = vector.shape_cast %40 : vector<16x32xf32> to vector<1x16x32xf32>
    %45 = vector.shape_cast %41 : vector<16x32xf32> to vector<1x16x32xf32>
    %46 = vector.shape_cast %42 : vector<16x32xf32> to vector<1x16x32xf32>
    %47 = tpu.concatenate %43, %44, %45, %46 in 0 : vector<1x16x32xf32>, vector<1x16x32xf32>, vector<1x16x32xf32>, vector<1x16x32xf32> -> vector<4x16x32xf32>
    %48 = arith.truncf %47 : vector<4x16x32xf32> to vector<4x16x32xbf16>
    %49 = vector.extract_strided_slice %38 {offsets = [0, 0], sizes = [16, 32], strides = [1, 1]} : vector<16x64xf32> to vector<16x32xf32>
    %50 = vector.extract_strided_slice %38 {offsets = [0, 32], sizes = [16, 32], strides = [1, 1]} : vector<16x64xf32> to vector<16x32xf32>
    %51 = vector.extract_strided_slice %16 {offsets = [0, 192], sizes = [16, 32], strides = [1, 1]} : vector<16x256xf32> to vector<16x32xf32>
    %52 = vector.extract_strided_slice %16 {offsets = [0, 224], sizes = [16, 32], strides = [1, 1]} : vector<16x256xf32> to vector<16x32xf32>
    %53 = vector.shape_cast %49 : vector<16x32xf32> to vector<1x16x32xf32>
    %54 = vector.shape_cast %49 : vector<16x32xf32> to vector<1x16x32xf32>
    %55 = vector.shape_cast %50 : vector<16x32xf32> to vector<1x16x32xf32>
    %56 = vector.shape_cast %50 : vector<16x32xf32> to vector<1x16x32xf32>
    %57 = tpu.concatenate %53, %54, %55, %56 in 0 : vector<1x16x32xf32>, vector<1x16x32xf32>, vector<1x16x32xf32>, vector<1x16x32xf32> -> vector<4x16x32xf32>
    %58 = arith.truncf %57 : vector<4x16x32xf32> to vector<4x16x32xbf16>
    %59 = vector.shape_cast %51 : vector<16x32xf32> to vector<1x16x32xf32>
    %60 = vector.shape_cast %51 : vector<16x32xf32> to vector<1x16x32xf32>
    %61 = vector.shape_cast %52 : vector<16x32xf32> to vector<1x16x32xf32>
    %62 = vector.shape_cast %52 : vector<16x32xf32> to vector<1x16x32xf32>
    %63 = tpu.concatenate %59, %60, %61, %62 in 0 : vector<1x16x32xf32>, vector<1x16x32xf32>, vector<1x16x32xf32>, vector<1x16x32xf32> -> vector<4x16x32xf32>
    %64 = arith.truncf %63 : vector<4x16x32xf32> to vector<4x16x32xbf16>
    "tpu.trace_start"() <{level = 10 : i32, message = "hqd,hkd->hqk"}> : () -> ()
    %cst_21 = arith.constant dense<0.000000e+00> : vector<4x16x16xf32>
    %65 = tpu.matmul %48, %58, %cst_21 {dimension_numbers = #tpu.dot_dimension_numbers<[2], [2], [1], [1], [0, 0, 0, 1, 1, 1], [0], [0]>} : vector<4x16x32xbf16>, vector<4x16x32xbf16>, vector<4x16x16xf32> -> vector<4x16x16xf32>
    "tpu.trace_stop"() : () -> ()
    %c0_22 = arith.constant 0 : index
    %c0_23 = arith.constant 0 : index
    %66 = vector.load %arg1[%c0_22, %c0_23] : memref<16x16xf32, #tpu.memory_space<vmem>>, vector<16x16xf32>
    %67 = vector.shape_cast %66 : vector<16x16xf32> to vector<1x16x16xf32>
    %68 = vector.broadcast %67 : vector<1x16x16xf32> to vector<4x16x16xf32>
    %69 = arith.addf %65, %68 : vector<4x16x16xf32>
    %cst_24 = arith.constant dense<0xFF800000> : vector<4x16xf32>
    %70 = vector.multi_reduction <maximumf>, %69, %cst_24 [2] : vector<4x16x16xf32> to vector<4x16xf32>
    %71 = vector.shape_cast %70 : vector<4x16xf32> to vector<4x16x1xf32>
    %72 = vector.broadcast %71 : vector<4x16x1xf32> to vector<4x16x16xf32>
    %73 = arith.subf %69, %72 : vector<4x16x16xf32>
    %74 = math.exp %73 : vector<4x16x16xf32>
    %cst_25 = arith.constant dense<0.000000e+00> : vector<4x16xf32>
    %75 = vector.multi_reduction <add>, %74, %cst_25 [2] : vector<4x16x16xf32> to vector<4x16xf32>
    %76 = vector.shape_cast %75 : vector<4x16xf32> to vector<4x16x1xf32>
    %77 = tpu.reciprocal %76 {approx = true} : vector<4x16x1xf32> -> vector<4x16x1xf32>
    %78 = vector.broadcast %77 : vector<4x16x1xf32> to vector<4x16x16xf32>
    %79 = arith.mulf %74, %78 : vector<4x16x16xf32>
    %80 = arith.truncf %79 : vector<4x16x16xf32> to vector<4x16x16xbf16>
    "tpu.trace_start"() <{level = 10 : i32, message = "hqk,hkd->hqd"}> : () -> ()
    %cst_26 = arith.constant dense<0.000000e+00> : vector<4x16x32xf32>
    %81 = tpu.matmul %80, %64, %cst_26 {dimension_numbers = #tpu.dot_dimension_numbers<[2], [1], [1], [2], [0, 0, 0, 1, 1, 2], [0], [0]>} : vector<4x16x16xbf16>, vector<4x16x32xbf16>, vector<4x16x32xf32> -> vector<4x16x32xf32>
    "tpu.trace_stop"() : () -> ()
    %82 = vector.extract_strided_slice %81 {offsets = [0, 0, 0], sizes = [1, 16, 32], strides = [1, 1, 1]} : vector<4x16x32xf32> to vector<1x16x32xf32>
    %83 = vector.shape_cast %82 : vector<1x16x32xf32> to vector<16x32xf32>
    %84 = vector.extract_strided_slice %81 {offsets = [1, 0, 0], sizes = [1, 16, 32], strides = [1, 1, 1]} : vector<4x16x32xf32> to vector<1x16x32xf32>
    %85 = vector.shape_cast %84 : vector<1x16x32xf32> to vector<16x32xf32>
    %86 = vector.extract_strided_slice %81 {offsets = [2, 0, 0], sizes = [1, 16, 32], strides = [1, 1, 1]} : vector<4x16x32xf32> to vector<1x16x32xf32>
    %87 = vector.shape_cast %86 : vector<1x16x32xf32> to vector<16x32xf32>
    %88 = vector.extract_strided_slice %81 {offsets = [3, 0, 0], sizes = [1, 16, 32], strides = [1, 1, 1]} : vector<4x16x32xf32> to vector<1x16x32xf32>
    %89 = vector.shape_cast %88 : vector<1x16x32xf32> to vector<16x32xf32>
    %90 = tpu.concatenate %83, %85, %87, %89 in 1 : vector<16x32xf32>, vector<16x32xf32>, vector<16x32xf32>, vector<16x32xf32> -> vector<16x128xf32>
    %91 = arith.truncf %90 : vector<16x128xf32> to vector<16x128xbf16>
    %c0_27 = arith.constant 0 : index
    %c0_28 = arith.constant 0 : index
    %92 = vector.load %arg9[%c0_27, %c0_28] : memref<128x128xbf16, #tpu.memory_space<vmem>>, vector<128x128xbf16>
    %cst_29 = arith.constant dense<0.000000e+00> : vector<16x128xf32>
    %93 = tpu.matmul %91, %92, %cst_29 {dimension_numbers = #tpu.dot_dimension_numbers<[1], [0], [0], [1], [0, 0, 1, 1], [], []>} : vector<16x128xbf16>, vector<128x128xbf16>, vector<16x128xf32> -> vector<16x128xf32>
    %94 = arith.addf %0, %93 : vector<16x128xf32>
    %95 = arith.mulf %94, %94 : vector<16x128xf32>
    %cst_30 = arith.constant dense<0.000000e+00> : vector<16xf32>
    %96 = vector.multi_reduction <add>, %95, %cst_30 [1] : vector<16x128xf32> to vector<16xf32>
    %97 = vector.shape_cast %96 : vector<16xf32> to vector<16x1xf32>
    %cst_31 = arith.constant 1.280000e+02 : f32
    %98 = vector.broadcast %cst_31 : f32 to vector<16x1xf32>
    %99 = arith.divf %97, %98 : vector<16x1xf32>
    %cst_32 = arith.constant 9.99999974E-6 : f32
    %100 = vector.broadcast %cst_32 : f32 to vector<16x1xf32>
    %101 = arith.addf %99, %100 : vector<16x1xf32>
    %102 = math.rsqrt %101 : vector<16x1xf32>
    %103 = vector.broadcast %102 : vector<16x1xf32> to vector<16x128xf32>
    %104 = arith.mulf %94, %103 : vector<16x128xf32>
    %c0_33 = arith.constant 0 : index
    %c0_34 = arith.constant 0 : index
    %105 = vector.load %arg13[%c0_33, %c0_34] : memref<1x128xf32, #tpu.memory_space<vmem>>, vector<1x128xf32>
    %106 = vector.broadcast %105 : vector<1x128xf32> to vector<16x128xf32>
    %107 = arith.mulf %104, %106 : vector<16x128xf32>
    %108 = arith.truncf %107 : vector<16x128xf32> to vector<16x128xbf16>
    %c0_35 = arith.constant 0 : index
    %c0_36 = arith.constant 0 : index
    %109 = vector.load %arg10[%c0_35, %c0_36] : memref<128x768xbf16, #tpu.memory_space<vmem>>, vector<128x768xbf16>
    %cst_37 = arith.constant dense<0.000000e+00> : vector<16x768xf32>
    %110 = tpu.matmul %108, %109, %cst_37 {dimension_numbers = #tpu.dot_dimension_numbers<[1], [0], [0], [1], [0, 0, 1, 1], [], []>} : vector<16x128xbf16>, vector<128x768xbf16>, vector<16x768xf32> -> vector<16x768xf32>
    %111 = vector.extract_strided_slice %110 {offsets = [0, 0], sizes = [16, 384], strides = [1, 1]} : vector<16x768xf32> to vector<16x384xf32>
    %112 = vector.extract_strided_slice %110 {offsets = [0, 384], sizes = [16, 384], strides = [1, 1]} : vector<16x768xf32> to vector<16x384xf32>
    %113 = arith.negf %111 : vector<16x384xf32>
    %114 = math.exp %113 : vector<16x384xf32>
    %cst_38 = arith.constant 1.000000e+00 : f32
    %115 = vector.broadcast %cst_38 : f32 to vector<16x384xf32>
    %116 = arith.addf %115, %114 : vector<16x384xf32>
    %117 = arith.divf %115, %116 : vector<16x384xf32>
    %118 = arith.mulf %111, %117 : vector<16x384xf32>
    %119 = arith.mulf %118, %112 : vector<16x384xf32>
    %120 = arith.truncf %119 : vector<16x384xf32> to vector<16x384xbf16>
    %c0_39 = arith.constant 0 : index
    %c0_40 = arith.constant 0 : index
    %121 = vector.load %arg11[%c0_39, %c0_40] : memref<384x128xbf16, #tpu.memory_space<vmem>>, vector<384x128xbf16>
    %cst_41 = arith.constant dense<0.000000e+00> : vector<16x128xf32>
    %122 = tpu.matmul %120, %121, %cst_41 {dimension_numbers = #tpu.dot_dimension_numbers<[1], [0], [0], [1], [0, 0, 1, 1], [], []>} : vector<16x384xbf16>, vector<384x128xbf16>, vector<16x128xf32> -> vector<16x128xf32>
    %123 = arith.addf %94, %122 : vector<16x128xf32>
    %c0_42 = arith.constant 0 : index
    %c0_43 = arith.constant 0 : index
    %124 = vector.load %arg14[%c0_42, %c0_43] : memref<16x128xf32, #tpu.memory_space<vmem>>, vector<16x128xf32>
    tpu.vector_store %arg14[%c0_42, %c0_43], %123 {strides = array<i32>} : memref<16x128xf32, #tpu.memory_space<vmem>>, vector<16x128xf32>,
    return
  }
}

</mosaic_0001>

<bundles_post_ra>
// kernel: tpu_custom_call.1
= control target key start
LH: loop header
LB: loop body
LE: loop exit
PB: predicated region body
PF: predicated region fallthrough
CT: control target
= control target key end

     0   :  { %19 = vsyncpa [#allocation3], 0  ;;  %s3138_s0 = inlined_call_operand.hbm [shape: f32[16,128], index: 0, kind: input, shape index: {}]   ;;  %s3139_s1 = inlined_call_operand.hbm [shape: f32[16,16], index: 1, kind: input, shape index: {}]   ;;  %s3140_s2 = inlined_call_operand.hbm [shape: f32[16,128], index: 2, kind: input, shape index: {}]   ;;  %s3141_s3 = inlined_call_operand.hbm [shape: f32[16,128], index: 3, kind: input, shape index: {}]   ;;  %s3142_s4 = inlined_call_operand.hbm [shape: f32[16,128], index: 4, kind: input, shape index: {}]   ;;  %s3143_s5 = inlined_call_operand.hbm [shape: f32[16,64], index: 5, kind: input, shape index: {}]   ;;  %s3144_s6 = inlined_call_operand.hbm [shape: f32[16,64], index: 6, kind: input, shape index: {}]   ;;  %s3145_s7 = inlined_call_operand.hbm [shape: f32[16,64], index: 7, kind: input, shape index: {}]   ;;  %s3146_s8 = inlined_call_operand.hbm [shape: bf16[128,256], index: 8, kind: input, shape index: {}]   ;;  %s3147_s9 = inlined_call_operand.hbm [shape: bf16[128,128], index: 9, kind: input, shape index: {}]   ;;  %s3148_s10 = inlined_call_operand.hbm [shape: bf16[128,768], index: 10, kind: input, shape index: {}]   ;;  %s3149_s11 = inlined_call_operand.hbm [shape: bf16[384,128], index: 11, kind: input, shape index: {}]   ;;  %s3150_s12 = inlined_call_operand.vmem [shape: f32[1,128], index: 12, kind: input, shape index: {}]   ;;  %s3151_s13 = inlined_call_operand.vmem [shape: f32[1,128], index: 13, kind: input, shape index: {}]   ;;  %s3152_s14 = inlined_call_operand.hbm [shape: f32[16,128], index: 14, kind: output, shape index: {}]  }
   0x1   :  { %20 = vsyncpa [#allocation6], 0 }
   0x2   :  { %21 = vsyncpa [#allocation9], 0 }
   0x3   :  { %22 = vsyncpa [#allocation12], 0 }
   0x4   :  { %23 = vsyncpa [#allocation15], 0 }
   0x5   :  { %24 = vsyncpa [#allocation18], 0 }
   0x6   :  { %25 = vsyncpa [#allocation21], 0 }
   0x7   :  { %26 = vsyncpa [#allocation4], 0  ;;  %s44_s15 = sshll.u32 %s3139_s1, 4  ;;  %s2725_s16 = smov [#allocation5]   ;;  %s45_s15 = int_to_ptr.hbm [resolvable:$true] %s44_s15 }
   0x8   :  { %s46_s17 = sshll.u32 %s2725_s16, 4  ;;  %s70_s20 = sshll.u32 %s3141_s3, 4  ;;  %s47_s17 = int_to_ptr.vmem [resolvable:$true] %s46_s17  ;;  %s71_s20 = int_to_ptr.hbm [resolvable:$true] %s70_s20 }
   0x9   :  { %s2726_s21 = smov 128   ;;  %s2727_s22 = smov 8  }
   0xa   :  { %52 = dma.hbm_to_vmem [thread:$0]  %s45_s15, 256, %s47_s17, [#allocation6], %s2726_s21, %s2726_s21, %s2727_s22  }
   0xb   :  { %s2728_s23 = smov [#allocation8]   ;;  %s96_s1 = sshll.u32 %s3143_s5, 4  ;;  %s97_s1 = int_to_ptr.hbm [resolvable:$true] %s96_s1 }
   0xc   :  { %s72_s24 = sshll.u32 %s2728_s23, 4  ;;  %s122_s28 = sshll.u32 %s3145_s7, 4  ;;  %s73_s24 = int_to_ptr.vmem [resolvable:$true] %s72_s24  ;;  %s123_s28 = int_to_ptr.hbm [resolvable:$true] %s122_s28 }
   0xd   :  { %78 = dma.hbm_to_vmem [thread:$0]  %s71_s20, 256, %s73_s24, [#allocation9], %s2726_s21, %s2726_s21, %s2727_s22  }
   0xe   :  { %s2729_s29 = smov [#allocation11]   ;;  %s2730_s15 = smov [#allocation14]  }
   0xf   :  { %s98_s30 = sshll.u32 %s2729_s29, 4  ;;  %s124_s5 = sshll.u32 %s2730_s15, 4  ;;  %s99_s30 = int_to_ptr.vmem [resolvable:$true] %s98_s30  ;;  %s125_s5 = int_to_ptr.vmem [resolvable:$true] %s124_s5 }
  0x10   :  { %104 = dma.hbm_to_vmem [thread:$0]  %s97_s1, 256, %s99_s30, [#allocation12], %s2726_s21, %s2726_s21, %s2727_s22  }
  0x11   :  { %s148_s18 = sshll.u32 %s3147_s9, 4  ;;  %s2731_s7 = smov [#allocation17]   ;;  %s149_s18 = int_to_ptr.hbm [resolvable:$true] %s148_s18 }
  0x12   :  { %130 = dma.hbm_to_vmem [thread:$0]  %s123_s28, 256, %s125_s5, [#allocation15], %s2726_s21, %s2726_s21, %s2727_s22  }
  0x13   :  { %s150_s19 = sshll.u32 %s2731_s7, 4  ;;  %s31_s24 = sshll.u32 %s3138_s0, 4  ;;  %s151_s19 = int_to_ptr.vmem [resolvable:$true] %s150_s19  ;;  %s32_s24 = int_to_ptr.hbm [resolvable:$true] %s31_s24 }
  0x14   :  { %s2732_s25 = smov 64   ;;  %s2733_s26 = smov 4  }
  0x15   :  { %156 = dma.hbm_to_vmem [thread:$0]  %s149_s18, 1024, %s151_s19, [#allocation18], %s2732_s25, %s2732_s25, %s2733_s26  }
  0x16   :  { %s2734_s9 = smov [#allocation2]   ;;  %s57_s28 = sshll.u32 %s3140_s2, 4  ;;  %s58_s28 = int_to_ptr.hbm [resolvable:$true] %s57_s28 }
  0x17   :  { %s33_s1 = sshll.u32 %s2734_s9, 4  ;;  %s83_s30 = sshll.u32 %s3142_s4, 4  ;;  %s34_s1 = int_to_ptr.vmem [resolvable:$true] %s33_s1  ;;  %s84_s30 = int_to_ptr.hbm [resolvable:$true] %s83_s30 }
  0x18   :  { %39 = dma.hbm_to_vmem [thread:$0]  %s32_s24, 256, %s34_s1, [#allocation3], %s2726_s21, %s2726_s21, %s2727_s22  }
  0x19   :  { %s2735_s15 = smov [#allocation7]   ;;  %s2736_s16 = smov [#allocation10]  }
  0x1a   :  { %s59_s5 = sshll.u32 %s2735_s15, 4  ;;  %s85_s2 = sshll.u32 %s2736_s16, 4  ;;  %s60_s5 = int_to_ptr.vmem [resolvable:$true] %s59_s5  ;;  %s86_s2 = int_to_ptr.vmem [resolvable:$true] %s85_s2 }
  0x1b   :  { %65 = dma.hbm_to_vmem [thread:$0]  %s58_s28, 256, %s60_s5, [#allocation6], %s2726_s21, %s2726_s21, %s2727_s22  }
  0x1c   :  { %s109_s7 = sshll.u32 %s3144_s6, 4  ;;  %s135_s20 = sshll.u32 %s3146_s8, 4  ;;  %s110_s7 = int_to_ptr.hbm [resolvable:$true] %s109_s7  ;;  %s136_s20 = int_to_ptr.hbm [resolvable:$true] %s135_s20 }
  0x1d   :  { %91 = dma.hbm_to_vmem [thread:$0]  %s84_s30, 256, %s86_s2, [#allocation9], %s2726_s21, %s2726_s21, %s2727_s22  }
  0x1e   :  { %s2737_s23 = smov [#allocation13]   ;;  %s2738_s9 = smov [#allocation16]  }
  0x1f   :  { %s111_s24 = sshll.u32 %s2737_s23, 4  ;;  %s137_s6 = sshll.u32 %s2738_s9, 4  ;;  %s112_s24 = int_to_ptr.vmem [resolvable:$true] %s111_s24  ;;  %s138_s6 = int_to_ptr.vmem [resolvable:$true] %s137_s6 }
  0x20   :  { %117 = dma.hbm_to_vmem [thread:$0]  %s110_s7, 256, %s112_s24, [#allocation12], %s2726_s21, %s2726_s21, %s2727_s22  }
  0x21   :  { %s161_s27 = sshll.u32 %s3148_s10, 4  ;;  %s2739_s8 = smov [#allocation19]   ;;  %s162_s27 = int_to_ptr.hbm [resolvable:$true] %s161_s27 }
  0x22   :  { %143 = dma.hbm_to_vmem [thread:$0]  %s136_s20, 2048, %s138_s6, [#allocation15], %s2726_s21, %s2726_s21, %s2727_s22  }
  0x23   :  { %s163_s28 = sshll.u32 %s2739_s8, 4  ;;  %s174_s30 = sshll.u32 %s3149_s11, 4  ;;  %s164_s28 = int_to_ptr.vmem [resolvable:$true] %s163_s28  ;;  %s175_s30 = int_to_ptr.hbm [resolvable:$true] %s174_s30 }
  0x24   :  { %s2740_s15 = smov 384   ;;  %s2741_s5 = smov 24  }
  0x25   :  { %169 = dma.hbm_to_vmem [thread:$0]  %s162_s27, 6144, %s164_s28, [#allocation18], %s2740_s15, %s2740_s15, %s2741_s5  }
  0x26   :  { %s2742_s16 = smov [#allocation20]  }
  0x27   :  { %s176_s2 = sshll.u32 %s2742_s16, 4  ;;  %s177_s2 = int_to_ptr.vmem [resolvable:$true] %s176_s2 }
  0x28   :  { %182 = dma.hbm_to_vmem [thread:$0]  %s175_s30, 3072, %s177_s2, [#allocation21], %s2732_s25, %s2732_s25, %s2733_s26  }
  0x29   :  { %2709 = dma.done.wait [#allocation3], 256  }
  0x2a   :  { %2710 = vsyncadd [#allocation3], 4294967040 }
  0x2b   :  { %2711 = dma.done.wait [#allocation6], 512  }
  0x2c   :  { %2712 = vsyncadd [#allocation6], 4294966784 }
  0x2d   :  { %2713 = dma.done.wait [#allocation9], 512  }
  0x2e   :  { %2714 = vsyncadd [#allocation9], 4294966784 }
  0x2f   :  { %2715 = dma.done.wait [#allocation12], 512  }
  0x30   :  { %2716 = vsyncadd [#allocation12], 4294966784 }
  0x31   :  { %2717 = dma.done.wait [#allocation15], 2304  }
  0x32   :  { %2718 = vsyncadd [#allocation15], 4294964992 }
  0x33   :  { %2719 = dma.done.wait [#allocation18], 7168  }
  0x34   :  { %2720 = vsyncadd [#allocation18], 4294960128 }
  0x35   :  { %2721 = dma.done.wait [#allocation21], 3072  }
  0x36   :  { %2722 = vsyncadd [#allocation21], 4294964224  ;;  %v2895_v0 = vld [vmem:[#allocation2] sm:$0xff]  ;;  %v2899_v2 = vld [vmem:[#allocation2 + $0x8] sm:$0xff]  ;;  %v2743_v9 = vmov 128.0   ;;  %s2744_s26 = smov 1  }
  0x37   :  { %v238_v1 = vmul.f32 %v2895_v0, %v2895_v0  ;;  %v239_v3 = vmul.f32 %v2899_v2, %v2899_v2  ;;  %v1827_v4 = vld [vmem:[#allocation16 + $0x70] sm:$0xf]  ;;  %v2182_v5 = vld [vmem:[#allocation16 + $0x74] sm:$0xf0]  ;;  %v2181_v6 = vld [vmem:[#allocation16 + $0x74] sm:$0xf]  ;;  %2331 = vrcp.f32 %v2743_v9 }
  0x38   :  { %v1828_v7 = vor.u32 %v2182_v5, %v1827_v4  ;;  %v1829_v8 = vld [vmem:[#allocation16 + $0x78] sm:$0xf0]  ;;  %v1819_v11 = vld [vmem:[#allocation16 + $0x60] sm:$0xf]  ;;  %v2180_v12 = vld [vmem:[#allocation16 + $0x64] sm:$0xf0] }
  0x39   :  { %240 = vadd.xlane.f32.xlu0 %v238_v1  ;;  %v1832_v10 = vor.u32 %v2181_v6, %v1829_v8  ;;  %v2179_v13 = vld [vmem:[#allocation16 + $0x64] sm:$0xf]  ;;  %v1820_v14 = vor.u32 %v2180_v12, %v1819_v11  ;;  %v1821_v15 = vld [vmem:[#allocation16 + $0x68] sm:$0xf0]  ;;  %v1811_v18 = vld [vmem:[#allocation16 + $0x50] sm:$0xf] }
  0x3a   :  { %380 = vmatpush.bf16.msra.mxu0 %v1828_v7  ;;  %v1824_v16 = vor.u32 %v2179_v13, %v1821_v15  ;;  %v2178_v19 = vld [vmem:[#allocation16 + $0x54] sm:$0xf0]  ;;  %v2177_v20 = vld [vmem:[#allocation16 + $0x54] sm:$0xf]  ;;  %v1813_v22 = vld [vmem:[#allocation16 + $0x58] sm:$0xf0] }
  0x3b   :  { %394 = vmatpush.bf16.msra.mxu1 %v1832_v10  ;;  %v1812_v21 = vor.u32 %v2178_v19, %v1811_v18  ;;  %v1816_v23 = vor.u32 %v2177_v20, %v1813_v22  ;;  %v1803_v25 = vld [vmem:[#allocation16 + $0x40] sm:$0xf]  ;;  %v2176_v26 = vld [vmem:[#allocation16 + $0x44] sm:$0xf0]  ;;  %v2175_v27 = vld [vmem:[#allocation16 + $0x44] sm:$0xf] }
  0x3c   :  { %v1804_v28 = vor.u32 %v2176_v26, %v1803_v25  ;;  %v1805_v29 = vld [vmem:[#allocation16 + $0x48] sm:$0xf0]  ;;  %v1795_v32 = vld [vmem:[#allocation16 + $0x30] sm:$0xf]  ;;  %v2174_v33 = vld [vmem:[#allocation16 + $0x34] sm:$0xf0] }
  0x3d   :  { %v2332_v17 = vpop.eup %2331  ;;  %v1808_v30 = vor.u32 %v2175_v27, %v1805_v29  ;;  %v2173_v34 = vld [vmem:[#allocation16 + $0x34] sm:$0xf]  ;;  %v1796_v35 = vor.u32 %v2174_v33, %v1795_v32  ;;  %v1797_v36 = vld [vmem:[#allocation16 + $0x38] sm:$0xf0]  ;;  %v1787_v39 = vld [vmem:[#allocation16 + $0x20] sm:$0xf] }
  0x3e   :  { %381 = vmatpush.bf16.msra.mxu0 %v1820_v14  ;;  %v245_v24 = vmul.f32 128.0, %v2332_v17  ;;  %v1800_v37 = vor.u32 %v2173_v34, %v1797_v36  ;;  %v2172_v40 = vld [vmem:[#allocation16 + $0x24] sm:$0xf0]  ;;  %v2171_v41 = vld [vmem:[#allocation16 + $0x24] sm:$0xf]  ;;  %vm249_vm0 = vweird.f32 %v2332_v17  ;;  %v437_v27 = vld [vmem:[#allocation14 + $0x8] sm:$0xff] }
  0x3f   :  { %395 = vmatpush.bf16.msra.mxu1 %v1824_v16  ;;  %v1788_v42 = vor.u32 %v2172_v40, %v1787_v39  ;;  %v1789_v43 = vld [vmem:[#allocation16 + $0x28] sm:$0xf0]  ;;  %v1779_v46 = vld [vmem:[#allocation16 + $0x10] sm:$0xf]  ;;  %v2170_v47 = vld [vmem:[#allocation16 + $0x14] sm:$0xf0] }
  0x40   :  { %v246_v31 = vsub.f32 1.0, %v245_v24  ;;  %v1792_v44 = vor.u32 %v2171_v41, %v1789_v43  ;;  %v2169_v48 = vld [vmem:[#allocation16 + $0x14] sm:$0xf]  ;;  %v1780_v49 = vor.u32 %v2170_v47, %v1779_v46  ;;  %v1781_v50 = vld [vmem:[#allocation16 + $0x18] sm:$0xf0]  ;;  %v434_v24 = vld [vmem:[#allocation13] sm:$0xff] }
  0x41   :  { %242 = vadd.xlane.f32.xlu0 %v239_v3  ;;  %v1771_v51 = vld [vmem:[#allocation16] sm:$0xf]  ;;  %v2168_v52 = vld [vmem:[#allocation16 + $0x4] sm:$0xf0]  ;;  %v1784_v53 = vor.u32 %v2169_v48, %v1781_v50  ;;  %v2167_v54 = vld [vmem:[#allocation16 + $0x4] sm:$0xf] }
  0x42   :  { %382 = vmatpush.bf16.msra.mxu0 %v1812_v21  ;;  %v247_v38 = vmul.f32 %v2332_v17, %v246_v31  ;;  %v1773_v55 = vld [vmem:[#allocation16 + $0x8] sm:$0xf0]  ;;  %v1772_v57 = vor.u32 %v2168_v52, %v1771_v51  ;;  %s2746_s17 = smov 127   ;;  %vm440_vm7 = vcmask 1048064   ;;  %v436_v33 = vld [vmem:[#allocation14] sm:$0xff]  ;;  %s2747_s18 = smov 65  }
  0x43   :  { %396 = vmatpush.bf16.msra.mxu1 %v1816_v23  ;;  %v1776_v58 = vor.u32 %v2167_v54, %v1773_v55  ;;  %v435_v26 = vld [vmem:[#allocation13 + $0x8] sm:$0xff]  ;;  %v433_v52 = vld [vmem:[#allocation11 + $0x8] sm:$0xff]  ;;  %s2748_s7 = smov 96   ;;  %vm557_vm8 = vcmask 261120   ;;  %s2749_s4 = smov 32   ;;  %vm652_vm9 = vcmask 130048  }
  0x44   :  { %v248_v45 = vadd.f32 %v2332_v17, %v247_v38  ;;  %vm879_vm10 = vcmask 523264   ;;  %vm882_vm11 = vcmask 785408   ;;  %s1750_s9 = sshll.u32 %s3152_s14, 4  ;;  %s1751_s9 = int_to_ptr.hbm [resolvable:$true] %s1750_s9 }
  0x46   :  { %383 = vmatpush.bf16.msra.mxu0 %v1804_v28  ;;  %v2903_v56 = vsel %vm249_vm0, %v2332_v17, %v248_v45  ;;  %v2329_v17 = vld [vmem:[%s3150_s12] ss:$0 sm:$0xff]  ;;  %s2745_s12 = smov 63  }
  0x47   :  { %397 = vmatpush.bf16.msra.mxu1 %v1808_v30 }
  0x4a   :  { %384 = vmatpush.bf16.msra.mxu0 %v1796_v35 }
  0x4b   :  { %398 = vmatpush.bf16.msra.mxu1 %v1800_v37 }
  0x4e   :  { %385 = vmatpush.bf16.msra.mxu0 %v1788_v42 }
  0x4f   :  { %399 = vmatpush.bf16.msra.mxu1 %v1792_v44 }
  0x52   :  { %386 = vmatpush.bf16.msra.mxu0 %v1780_v49  ;;  %v432_v49 = vld [vmem:[#allocation11] sm:$0xff] }
  0x53   :  { %400 = vmatpush.bf16.msra.mxu1 %v1784_v53 }
  0x55   :  { %455 = vrot.lane.b32.xlu0 %v434_v24, %s2744_s26 }
  0x56   :  { %387 = vmatpush.bf16.msra.mxu0 %v1772_v57 }
  0x57   :  { %401 = vmatpush.bf16.msra.mxu1 %v1776_v58 }
  0xac   :  { %v241_v59 = vpop.xlane.xlu0 %240 }
  0xad   :  { %v251_v60 = vmul.f32 %v2903_v56, %v241_v59  ;;  %v410_v59 = vld [vmem:[#allocation8] sm:$0xff] }
  0xaf   :  { %v253_v61 = vadd.f32 1e-05, %v251_v60 }
  0xb1   :  { %2333 = vrsqrt.f32 %v253_v61  ;;  %vm261_vm2 = vweird.f32 %v253_v61 }
  0xb4   :  { %v243_v62 = vpop.xlane.xlu0 %242 }
  0xb5   :  { %v252_v63 = vmul.f32 %v2903_v56, %v243_v62 }
  0xb7   :  { %v2334_v1 = vpop.eup %2333  ;;  %v254_v3 = vadd.f32 1e-05, %v252_v63  ;;  %v408_v63 = vld [vmem:[#allocation7] sm:$0xff] }
  0xb8   :  { %v256_v4 = vmul.f32 %v2334_v1, %v253_v61  ;;  %vm262_vm1 = vweird.f32 %v2334_v1  ;;  %v411_v61 = vld [vmem:[#allocation8 + $0x8] sm:$0xff] }
  0xb9   :  { %2335 = vrsqrt.f32 %v254_v3  ;;  %vm263_vm3 = vmor %vm261_vm2, %vm262_vm1  ;;  %vm271_vm5 = vweird.f32 %v254_v3 }
  0xba   :  { %v257_v5 = vmul.f32 %v2334_v1, %v256_v4  ;;  %v409_v4 = vld [vmem:[#allocation7 + $0x8] sm:$0xff] }
  0xbc   :  { %v258_v6 = vmul.f32 0.5, %v257_v5 }
  0xbe   :  { %v259_v7 = vsub.f32 1.5, %v258_v6 }
  0xbf   :  { %v2336_v8 = vpop.eup %2335 }
  0xc0   :  { %v266_v9 = vmul.f32 %v2336_v8, %v254_v3  ;;  %v260_v10 = vmul.f32 %v2334_v1, %v259_v7  ;;  %vm272_vm4 = vweird.f32 %v2336_v8 }
  0xc1   :  { %vm273_vm6 = vmor %vm271_vm5, %vm272_vm4 }
  0xc2   :  { %v267_v11 = vmul.f32 %v2336_v8, %v266_v9  ;;  %v264_v14 = vsel %vm263_vm3, %v2334_v1, %v260_v10  ;;  %v413_v10 = vld [vmem:[#allocation10 + $0x8] sm:$0xff] }
  0xc3   :  { %v275_v16 = vmul.f32 %v264_v14, %v2895_v0 }
  0xc4   :  { %v268_v12 = vmul.f32 0.5, %v267_v11  ;;  %v412_v11 = vld [vmem:[#allocation10] sm:$0xff] }
  0xc5   :  { %v281_v20 = vmul.f32 %v2329_v17, %v275_v16 }
  0xc6   :  { %v269_v13 = vsub.f32 1.5, %v268_v12 }
  0xc7   :  { %v456_v35 = vpop.permute.xlu0 %455 }
  0xc8   :  { %v270_v15 = vmul.f32 %v2336_v8, %v269_v13 }
  0xca   :  { %v274_v18 = vsel %vm273_vm6, %v2336_v8, %v270_v15 }
  0xcb   :  { %v276_v19 = vmul.f32 %v274_v18, %v2899_v2 }
  0xcd   :  { %v282_v21 = vmul.f32 %v2329_v17, %v276_v19 }
  0xcf   :  { %v283_v22 = vpack.c.bf16 %v282_v21, %v281_v20 }
  0xd1   :  { %388 = vmatmul.bf16.vlgmr.msra.gmra.mxu0 %v283_v22  ;;  %402 = vmatmul.bf16.vlgmr.msra.gmra.mxu1 %v283_v22 }
 0x14e   :  { %v2912_v23 = vpop.f32.mrf.mxu1  ;;  %v389_v28 = vpop.f32.mrf.mxu0 }
 0x14f   :  { %441 = vrot.lane.b32.xlu1 %v2912_v23, %s2732_s25  ;;  %v438_v51 = vmul.f32 %v432_v49, %v2912_v23  ;;  %v414_v9 = vmul.f32 %v408_v63, %v389_v28 }
 0x156   :  { %v2917_v25 = vpop.f32.mrf.mxu1  ;;  %v391_v46 = vpop.f32.mrf.mxu0 }
 0x157   :  { %444 = vrot.lane.b32.xlu1 %v2917_v25, %s2732_s25  ;;  %v439_v55 = vmul.f32 %v433_v52, %v2917_v25  ;;  %v415_v12 = vmul.f32 %v409_v4, %v391_v46 }
 0x15f   :  { %457 = vrot.lane.b32.xlu1 %v435_v26, %s2744_s26 }
 0x167   :  { %477 = vrot.lane.b32.xlu1 %v437_v27, %s2745_s12 }
 0x16f   :  { %416 = vrot.lane.b32.xlu1 %v389_v28, %s2746_s17 }
 0x1c1   :  { %v442_v29 = vpop.permute.xlu1 %441 }
 0x1c2   :  { %v443_v30 = vsel %vm440_vm7, %v442_v29, %v2912_v23 }
 0x1c3   :  { %447 = vrot.lane.b32.xlu2 %v443_v30, %s2732_s25 }
 0x1c9   :  { %v445_v31 = vpop.permute.xlu1 %444 }
 0x1ca   :  { %v446_v32 = vsel %vm440_vm7, %v445_v31, %v2917_v25 }
 0x1cb   :  { %449 = vrot.lane.b32.xlu2 %v446_v32, %s2732_s25 }
 0x1d1   :  { %v458_v34 = vpop.permute.xlu1 %457 }
 0x1d3   :  { %475 = vrot.lane.b32.xlu2 %v436_v33, %s2745_s12 }
 0x1d9   :  { %v478_v40 = vpop.permute.xlu1 %477 }
 0x1e1   :  { %v417_v48 = vpop.permute.xlu1 %416 }
 0x1e2   :  { %v420_v5 = vmul.f32 %v417_v48, %v410_v59 }
 0x1e4   :  { %v422_v15 = vadd.f32 %v420_v5, %v414_v9  ;;  %v545_v5 = vld [vmem:[#allocation5] sm:$0xff] }
 0x21d   :  { %v448_v36 = vpop.permute.xlu2 %447 }
 0x21e   :  { %v451_v37 = vsel %vm440_vm7, %v448_v36, %v2912_v23 }
 0x21f   :  { %v461_v38 = vmul.f32 %v456_v35, %v451_v37 }
 0x221   :  { %465 = vrot.lane.b32.xlu2 %v461_v38, %s2746_s17 }
 0x225   :  { %v450_v39 = vpop.permute.xlu2 %449 }
 0x226   :  { %v452_v41 = vsel %vm440_vm7, %v450_v39, %v2917_v25 }
 0x227   :  { %v462_v42 = vmul.f32 %v458_v34, %v452_v41  ;;  %v482_v43 = vmul.f32 %v478_v40, %v452_v41 }
 0x229   :  { %487 = vrot.lane.b32.xlu0 %v482_v43, %s2747_s18  ;;  %467 = vrot.lane.b32.xlu1 %v462_v42, %s2746_s17 }
 0x22d   :  { %v476_v44 = vpop.permute.xlu2 %475 }
 0x22e   :  { %v481_v45 = vmul.f32 %v476_v44, %v451_v37 }
 0x230   :  { %485 = vrot.lane.b32.xlu2 %v481_v45, %s2747_s18 }
 0x231   :  { %424 = vrot.lane.b32.xlu0 %v389_v28, %s2744_s26  ;;  %426 = vrot.lane.b32.xlu1 %v391_v46, %s2744_s26 }
 0x238   :  { %418 = vrot.lane.b32.xlu2 %v391_v46, %s2746_s17 }
 0x27b   :  { %v466_v47 = vpop.permute.xlu2 %465 }
 0x27c   :  { %v471_v53 = vadd.f32 %v466_v47, %v438_v51 }
 0x28a   :  { %v486_v50 = vpop.permute.xlu2 %485 }
 0x28b   :  { %v491_v54 = vadd.f32 %v486_v50, %v471_v53 }
 0x28d   :  { %v529_v1 = vpack.c.bf16 %v491_v54, %v491_v54 }
 0x28f   :  { %v554_v13 = vunpack.c.l.b16 %v529_v1 }
 0x292   :  { %v419_v62 = vpop.permute.xlu2 %418 }
 0x293   :  { %v421_v6 = vmul.f32 %v419_v62, %v411_v61 }
 0x295   :  { %v423_v18 = vadd.f32 %v421_v6, %v415_v12  ;;  %v546_v12 = vld [vmem:[#allocation5 + $0x8] sm:$0xff] }
 0x29b   :  { %v468_v57 = vpop.permute.xlu1 %467  ;;  %v488_v58 = vpop.permute.xlu0 %487 }
 0x29c   :  { %v472_v60 = vadd.f32 %v468_v57, %v439_v55 }
 0x29e   :  { %v492_v3 = vadd.f32 %v488_v58, %v472_v60 }
 0x2a0   :  { %v2289_v7 = vpack.i.bf16 %v492_v3, %v491_v54  ;;  %v530_v8 = vpack.c.bf16 %v492_v3, %v492_v3 }
 0x2a2   :  { %v555_v14 = vunpack.c.l.b16 %v530_v8  ;;  %2290 = vrot.lane.b32.xlu2 %v2289_v7, %s2748_s7 }
 0x2a3   :  { %v427_v16 = vpop.permute.xlu1 %426  ;;  %v425_v17 = vpop.permute.xlu0 %424 }
 0x2a4   :  { %v429_v19 = vmul.f32 %v427_v16, %v413_v10  ;;  %v428_v20 = vmul.f32 %v425_v17, %v412_v11  ;;  %v556_v21 = vpack.c.b16 %v555_v14, %v554_v13 }
 0x2a6   :  { %v431_v22 = vadd.f32 %v429_v19, %v423_v18  ;;  %v430_v24 = vadd.f32 %v428_v20, %v422_v15  ;;  %v562_v26 = vsel %vm557_vm8, %v556_v21, 0 }
 0x2a7   :  { %571 = vmatpush.bf16.xpose.msrb.mxu0 %v562_v26  ;;  %593 = vmatpush.bf16.xpose.msrb.mxu1 %v562_v26 }
 0x2a8   :  { %v2304_v27 = vpack.i.bf16 %v431_v22, %v430_v24  ;;  %v513_v28 = vpack.c.bf16 %v430_v24, %v430_v24  ;;  %v514_v29 = vpack.c.bf16 %v431_v22, %v431_v22 }
 0x2aa   :  { %2305 = vrot.lane.b32.xlu2 %v2304_v27, %s2749_s4  ;;  %2300 = vrot.lane.b32.xlu1 %v2304_v27, %s2732_s25  ;;  %v549_v30 = vunpack.c.l.b16 %v513_v28  ;;  %v550_v31 = vunpack.c.l.b16 %v514_v29 }
 0x2ab   :  { %2295 = vrot.lane.b32.xlu0 %v2304_v27, %s2748_s7 }
 0x2ac   :  { %v551_v32 = vpack.c.b16 %v550_v31, %v549_v30 }
 0x2ae   :  { %1833 = vmatmul.msk.bf16.vlgmr.msrb.gmra.mxu0 %vm557_vm8, %v551_v32 }
 0x2fc   :  { %v2291_v33 = vpop.permute.xlu2 %2290 }
 0x2fd   :  { %v2293_v34 = vunpack.i.h.bf16 %v2291_v33  ;;  %v2292_v35 = vunpack.i.l.bf16 %v2291_v33  ;;  %v2309_v33 = vpack.i.bf16 %v2917_v25, %v2912_v23 }
 0x2ff   :  { %v532_v36 = vpack.c.bf16 %v2293_v34, %v2293_v34  ;;  %v531_v37 = vpack.c.bf16 %v2292_v35, %v2292_v35 }
 0x301   :  { %v608_v38 = vunpack.c.l.b16 %v532_v36  ;;  %v607_v39 = vunpack.c.l.b16 %v531_v37 }
 0x303   :  { %v609_v40 = vpack.c.b16 %v608_v38, %v607_v39 }
 0x304   :  { %v2306_v41 = vpop.permute.xlu2 %2305 }
 0x305   :  { %v2308_v42 = vunpack.i.h.bf16 %v2306_v41  ;;  %v2307_v43 = vunpack.i.l.bf16 %v2306_v41  ;;  %v614_v44 = vsel %vm557_vm8, %v609_v40, 0 }
 0x306   :  { %623 = vmatpush.bf16.xpose.msra.mxu2 %v614_v44  ;;  %645 = vmatpush.bf16.xpose.msra.mxu3 %v614_v44 }
 0x307   :  { %v520_v45 = vpack.c.bf16 %v2308_v42, %v2308_v42  ;;  %v519_v46 = vpack.c.bf16 %v2307_v43, %v2307_v43 }
 0x309   :  { %v633_v47 = vunpack.c.l.b16 %v520_v45  ;;  %v632_v48 = vunpack.c.l.b16 %v519_v46 }
 0x30b   :  { %v634_v49 = vpack.c.b16 %v633_v47, %v632_v48 }
 0x30d   :  { %1836 = vmatmul.msk.bf16.vlgmr.msra.gmra.mxu3 %vm557_vm8, %v634_v49 }
 0x31c   :  { %v2301_v50 = vpop.permute.xlu1 %2300 }
 0x31d   :  { %v2303_v51 = vunpack.i.h.bf16 %v2301_v50  ;;  %v2302_v52 = vunpack.i.l.bf16 %v2301_v50  ;;  %v2296_v53 = vpop.permute.xlu0 %2295 }
 0x31e   :  { %v2298_v54 = vunpack.i.h.bf16 %v2296_v53  ;;  %v2297_v55 = vunpack.i.l.bf16 %v2296_v53 }
 0x31f   :  { %v518_v57 = vpack.c.bf16 %v2303_v51, %v2303_v51  ;;  %v517_v58 = vpack.c.bf16 %v2302_v52, %v2302_v52 }
 0x320   :  { %v516_v59 = vpack.c.bf16 %v2298_v54, %v2298_v54  ;;  %v515_v60 = vpack.c.bf16 %v2297_v55, %v2297_v55 }
 0x321   :  { %v603_v61 = vunpack.c.l.b16 %v518_v57  ;;  %v602_v62 = vunpack.c.l.b16 %v517_v58 }
 0x322   :  { %v581_v63 = vunpack.c.l.b16 %v516_v59  ;;  %v580_v1 = vunpack.c.l.b16 %v515_v60 }
 0x323   :  { %v604_v3 = vpack.c.b16 %v603_v61, %v602_v62 }
 0x324   :  { %v582_v4 = vpack.c.b16 %v581_v63, %v580_v1 }
 0x325   :  { %1835 = vmatmul.msk.bf16.vlgmr.msra.gmra.mxu2 %vm557_vm8, %v604_v3 }
 0x326   :  { %1834 = vmatmul.msk.bf16.vlgmr.msrb.gmra.mxu1 %vm557_vm8, %v582_v4 }
 0x32b   :  { %v573_v8 = vpop.f32.mrf.mxu0 }
 0x32c   :  { %v2959_v28 = vadd.f32 %v573_v8, %v545_v5 }
 0x32e   :  { %v653_v31 = vsel %vm652_vm9, %v2959_v28, -inf }
 0x333   :  { %v575_v18 = vpop.f32.mrf.mxu0 }
 0x334   :  { %v2953_v22 = vadd.f32 %v575_v18, %v546_v12 }
 0x336   :  { %v656_v27 = vsel %vm652_vm9, %v2953_v22, -inf }
 0x390   :  { %v647_v15 = vpop.f32.mrf.mxu3 }
 0x391   :  { %v648_v19 = vadd.f32 %v647_v15, %v545_v5 }
 0x393   :  { %v671_v24 = vsel %vm652_vm9, %v648_v19, -inf }
 0x398   :  { %v649_v29 = vpop.f32.mrf.mxu3 }
 0x399   :  { %v650_v30 = vadd.f32 %v649_v29, %v546_v12 }
 0x39b   :  { %v674_v32 = vsel %vm652_vm9, %v650_v30, -inf }
 0x3a3   :  { %v595_v6 = vpop.f32.mrf.mxu1 }
 0x3a4   :  { %v596_v7 = vadd.f32 %v595_v6, %v545_v5  ;;  %v541_v6 = vpack.c.bf16 %v2912_v23, %v2912_v23 }
 0x3a6   :  { %v659_v9 = vsel %vm652_vm9, %v596_v7, -inf }
 0x3a7   :  { %660 = vmax.xlane.f32.xlu0 %v659_v9 }
 0x3a8   :  { %v625_v10 = vpop.f32.mrf.mxu2 }
 0x3a9   :  { %v626_v11 = vadd.f32 %v625_v10, %v545_v5  ;;  %v542_v5 = vpack.c.bf16 %v2917_v25, %v2917_v25  ;;  %v756_v10 = vunpack.c.l.b16 %v541_v6 }
 0x3ab   :  { %v597_v13 = vpop.f32.mrf.mxu1  ;;  %v665_v14 = vsel %vm652_vm9, %v626_v11, -inf  ;;  %v757_v9 = vunpack.c.l.b16 %v542_v5 }
 0x3ac   :  { %v598_v16 = vadd.f32 %v597_v13, %v546_v12  ;;  %666 = vmax.xlane.f32.xlu2 %v665_v14 }
 0x3ad   :  { %v758_v13 = vpack.c.b16 %v757_v9, %v756_v10 }
 0x3ae   :  { %v662_v17 = vsel %vm652_vm9, %v598_v16, -inf }
 0x3af   :  { %663 = vmax.xlane.f32.xlu1 %v662_v17 }
 0x3b0   :  { %v627_v20 = vpop.f32.mrf.mxu2 }
 0x3b1   :  { %v628_v21 = vadd.f32 %v627_v20, %v546_v12 }
 0x3b3   :  { %v668_v26 = vsel %vm652_vm9, %v628_v21, -inf }
 0x3b4   :  { %672 = vmax.xlane.f32.xlu2 %v671_v24  ;;  %669 = vmax.xlane.f32.xlu0 %v668_v26 }
 0x3b7   :  { %657 = vmax.xlane.f32.xlu1 %v656_v27 }
 0x3bc   :  { %654 = vmax.xlane.f32.xlu2 %v653_v31 }
 0x3bf   :  { %675 = vmax.xlane.f32.xlu1 %v674_v32 }
 0x3c8   :  { %2310 = vrot.lane.b32.xlu0 %v2309_v33, %s2748_s7 }
 0x41a   :  { %v661_v34 = vpop.xlane.xlu0 %660 }
 0x41b   :  { %v679_v35 = vsub.f32 %v596_v7, %v661_v34 }
 0x41d   :  { %v689_v36 = vmul.f32 1.442695, %v679_v35 }
 0x41f   :  { %2337 = vpow2.f32 %v689_v36  ;;  %v667_v37 = vpop.xlane.xlu2 %666 }
 0x420   :  { %v681_v38 = vsub.f32 %v626_v11, %v667_v37 }
 0x422   :  { %v693_v39 = vmul.f32 1.442695, %v681_v38  ;;  %v664_v40 = vpop.xlane.xlu1 %663 }
 0x423   :  { %v680_v41 = vsub.f32 %v598_v16, %v664_v40 }
 0x424   :  { %2339 = vpow2.f32 %v693_v39 }
 0x425   :  { %v2967_v42 = vpop.eup %2337  ;;  %v691_v43 = vmul.f32 1.442695, %v680_v41 }
 0x426   :  { %v707_v44 = vsel %vm652_vm9, %v2967_v42, 0.0 }
 0x427   :  { %2341 = vpow2.f32 %v691_v43  ;;  %708 = vadd.xlane.f32.xlu2 %v707_v44  ;;  %v673_v45 = vpop.xlane.xlu2 %672  ;;  %v670_v46 = vpop.xlane.xlu0 %669 }
 0x428   :  { %v683_v47 = vsub.f32 %v648_v19, %v673_v45  ;;  %v682_v48 = vsub.f32 %v628_v21, %v670_v46 }
 0x42a   :  { %v697_v49 = vmul.f32 1.442695, %v683_v47  ;;  %v695_v50 = vmul.f32 1.442695, %v682_v48  ;;  %v658_v51 = vpop.xlane.xlu1 %657  ;;  %v2340_v52 = vpop.eup %2339 }
 0x42b   :  { %v713_v55 = vsel %vm652_vm9, %v2340_v52, 0.0  ;;  %v678_v23 = vsub.f32 %v2953_v22, %v658_v51 }
 0x42c   :  { %2343 = vpow2.f32 %v697_v49 }
 0x42d   :  { %v2971_v53 = vpop.eup %2341  ;;  %2345 = vpow2.f32 %v695_v50  ;;  %v687_v19 = vmul.f32 1.442695, %v678_v23  ;;  %v2190_v23 = vld [vmem:[#allocation17 + $0x38] sm:$0xff] }
 0x42e   :  { %v710_v54 = vsel %vm652_vm9, %v2971_v53, 0.0 }
 0x42f   :  { %711 = vadd.xlane.f32.xlu1 %v710_v54  ;;  %714 = vadd.xlane.f32.xlu2 %v713_v55  ;;  %v655_v17 = vpop.xlane.xlu2 %654 }
 0x430   :  { %v677_v25 = vsub.f32 %v2959_v28, %v655_v17 }
 0x432   :  { %v2344_v57 = vpop.eup %2343  ;;  %v676_v58 = vpop.xlane.xlu1 %675  ;;  %v685_v18 = vmul.f32 1.442695, %v677_v25 }
 0x433   :  { %v2346_v59 = vpop.eup %2345  ;;  %v684_v60 = vsub.f32 %v650_v30, %v676_v58  ;;  %v719_v63 = vsel %vm652_vm9, %v2344_v57, 0.0 }
 0x434   :  { %v716_v61 = vsel %vm652_vm9, %v2346_v59, 0.0 }
 0x435   :  { %v699_v62 = vmul.f32 1.442695, %v684_v60  ;;  %717 = vadd.xlane.f32.xlu0 %v716_v61 }
 0x437   :  { %2347 = vpow2.f32 %v699_v62  ;;  %720 = vadd.xlane.f32.xlu1 %v719_v63 }
 0x438   :  { %2349 = vpow2.f32 %v685_v18 }
 0x439   :  { %2351 = vpow2.f32 %v687_v19  ;;  %v2189_v19 = vld [vmem:[#allocation17 + $0x30] sm:$0xff] }
 0x43a   :  { %v2311_v4 = vpop.permute.xlu0 %2310 }
 0x43b   :  { %v2313_v7 = vunpack.i.h.bf16 %v2311_v4  ;;  %v2312_v8 = vunpack.i.l.bf16 %v2311_v4 }
 0x43d   :  { %v2348_v1 = vpop.eup %2347  ;;  %v544_v11 = vpack.c.bf16 %v2313_v7, %v2313_v7  ;;  %v543_v12 = vpack.c.bf16 %v2312_v8, %v2312_v8 }
 0x43e   :  { %v722_v3 = vsel %vm652_vm9, %v2348_v1, 0.0  ;;  %v2350_v20 = vpop.eup %2349 }
 0x43f   :  { %723 = vadd.xlane.f32.xlu2 %v722_v3  ;;  %v809_v14 = vunpack.c.l.b16 %v544_v11  ;;  %v808_v15 = vunpack.c.l.b16 %v543_v12  ;;  %v701_v21 = vsel %vm652_vm9, %v2350_v20, 0.0  ;;  %v2352_v24 = vpop.eup %2351 }
 0x440   :  { %v704_v26 = vsel %vm652_vm9, %v2352_v24, 0.0 }
 0x441   :  { %v810_v16 = vpack.c.b16 %v809_v14, %v808_v15 }
 0x450   :  { %759 = vrot.lane.b32.xlu1 %v758_v13, %s2732_s25 }
 0x457   :  { %811 = vrot.lane.b32.xlu2 %v810_v16, %s2732_s25 }
 0x47a   :  { %702 = vadd.xlane.f32.xlu1 %v701_v21  ;;  %v2187_v21 = vld [vmem:[#allocation17 + $0x20] sm:$0xff] }
 0x480   :  { %705 = vadd.xlane.f32.xlu2 %v704_v26  ;;  %v2185_v26 = vld [vmem:[#allocation17 + $0x10] sm:$0xff] }
 0x49a   :  { %v709_v27 = vpop.xlane.xlu2 %708 }
 0x4a2   :  { %v712_v29 = vpop.xlane.xlu1 %711  ;;  %v715_v30 = vpop.xlane.xlu2 %714 }
 0x4a3   :  { %2353 = vrcp.f32 %v715_v30 }
 0x4a8   :  { %v718_v31 = vpop.xlane.xlu0 %717 }
 0x4a9   :  { %2355 = vrcp.f32 %v718_v31  ;;  %v2354_v22 = vpop.eup %2353 }
 0x4aa   :  { %v721_v28 = vpop.xlane.xlu1 %720  ;;  %v737_v34 = vmul.f32 %v2354_v22, %v2340_v52 }
 0x4ab   :  { %2357 = vrcp.f32 %v721_v28 }
 0x4ac   :  { %2359 = vrcp.f32 %v712_v29  ;;  %v745_v39 = vpack.c.bf16 %v737_v34, %v737_v34  ;;  %v2183_v29 = vld [vmem:[#allocation17] sm:$0xff] }
 0x4ad   :  { %2361 = vrcp.f32 %v709_v27  ;;  %v2184_v27 = vld [vmem:[#allocation17 + $0x8] sm:$0xff] }
 0x4ae   :  { %v803_v47 = vunpack.c.l.b16 %v745_v39 }
 0x4af   :  { %v2356_v32 = vpop.eup %2355 }
 0x4b0   :  { %v738_v33 = vmul.f32 %v2356_v32, %v2346_v59 }
 0x4b1   :  { %v2358_v36 = vpop.eup %2357 }
 0x4b2   :  { %v724_v35 = vpop.xlane.xlu2 %723  ;;  %v746_v37 = vpack.c.bf16 %v738_v33, %v738_v33  ;;  %v2360_v38 = vpop.eup %2359  ;;  %v739_v40 = vmul.f32 %v2358_v36, %v2344_v57 }
 0x4b3   :  { %2363 = vrcp.f32 %v724_v35  ;;  %v2362_v41 = vpop.eup %2361  ;;  %v736_v43 = vmul.f32 %v2360_v38, %v2971_v53 }
 0x4b4   :  { %v804_v44 = vunpack.c.l.b16 %v746_v37  ;;  %v735_v46 = vmul.f32 %v2362_v41, %v2967_v42  ;;  %v747_v48 = vpack.c.bf16 %v739_v40, %v739_v40 }
 0x4b5   :  { %v744_v51 = vpack.c.bf16 %v736_v43, %v736_v43 }
 0x4b6   :  { %v805_v52 = vpack.c.b16 %v804_v44, %v803_v47  ;;  %v743_v55 = vpack.c.bf16 %v735_v46, %v735_v46  ;;  %v833_v58 = vunpack.c.l.b16 %v747_v48  ;;  %v2043_v47 = vld [vmem:[#allocation19 + $0x150] sm:$0xf]  ;;  %v2236_v48 = vld [vmem:[#allocation19 + $0x164] sm:$0xf0] }
 0x4b7   :  { %v782_v57 = vunpack.c.l.b16 %v744_v51  ;;  %v2045_v51 = vld [vmem:[#allocation19 + $0x168] sm:$0xf0] }
 0x4b8   :  { %v781_v60 = vunpack.c.l.b16 %v743_v55 }
 0x4b9   :  { %v2364_v45 = vpop.eup %2363 }
 0x4ba   :  { %v740_v49 = vmul.f32 %v2364_v45, %v2348_v1  ;;  %v812_v50 = vpop.permute.xlu2 %811  ;;  %v783_v42 = vpack.c.b16 %v782_v57, %v781_v60 }
 0x4bb   :  { %824 = vmatpush.bf16.msra.mxu0 %v812_v50  ;;  %846 = vmatpush.bf16.msra.mxu1 %v812_v50  ;;  %v2044_v50 = vor.u32 %v2236_v48, %v2043_v47  ;;  %v1901_v48 = vld [vmem:[#allocation19 + $0x48] sm:$0xf0] }
 0x4bc   :  { %v748_v54 = vpack.c.bf16 %v740_v49, %v740_v49  ;;  %v2233_v49 = vld [vmem:[#allocation19 + $0x154] sm:$0xf] }
 0x4bd   :  { %v2048_v55 = vor.u32 %v2233_v49, %v2045_v51  ;;  %v1979_v49 = vld [vmem:[#allocation19 + $0xc8] sm:$0xf] }
 0x4be   :  { %v834_v59 = vunpack.c.l.b16 %v748_v54  ;;  %1839 = vmatmul.msk.bf16.vlgmr.msra.gmra.mxu0 %vm652_vm9, %v805_v52  ;;  %v2019_v52 = vld [vmem:[#allocation19 + $0x120] sm:$0xf]  ;;  %v2230_v54 = vld [vmem:[#allocation19 + $0x134] sm:$0xf0] }
 0x4bf   :  { %v2020_v57 = vor.u32 %v2230_v54, %v2019_v52  ;;  %1307 = vmatpush.bf16.msrb.mxu0 %v2048_v55  ;;  %v2216_v54 = vld [vmem:[#allocation19 + $0xcc] sm:$0xf]  ;;  %v1981_v55 = vld [vmem:[#allocation19 + $0xe0] sm:$0xf0] }
 0x4c0   :  { %v835_v53 = vpack.c.b16 %v834_v59, %v833_v58  ;;  %v2227_v58 = vld [vmem:[#allocation19 + $0x124] sm:$0xf]  ;;  %v2021_v59 = vld [vmem:[#allocation19 + $0x138] sm:$0xf0] }
 0x4c2   :  { %v760_v61 = vpop.permute.xlu1 %759  ;;  %1840 = vmatmul.msk.bf16.vlgmr.msra.gmra.mxu1 %vm652_vm9, %v835_v53  ;;  %v2024_v53 = vor.u32 %v2227_v58, %v2021_v59  ;;  %v1984_v58 = vor.u32 %v2216_v54, %v1981_v55  ;;  %v1875_v59 = vld [vmem:[#allocation19] sm:$0xf]  ;;  %v2214_v54 = vld [vmem:[#allocation19 + $0xb4] sm:$0xf0]  ;;  %v2211_v55 = vld [vmem:[#allocation19 + $0xa4] sm:$0xf] }
 0x4c3   :  { %772 = vmatpush.bf16.msrb.mxu2 %v760_v61  ;;  %794 = vmatpush.bf16.msrb.mxu3 %v760_v61 }
 0x4c4   :  { %1308 = vmatpush.bf16.msrb.mxu0 %v2024_v53  ;;  %v2191_v53 = vld [vmem:[#allocation19 + $0x4] sm:$0xf] }
 0x4c6   :  { %1838 = vmatmul.msk.bf16.vlgmr.msrb.gmra.mxu3 %vm652_vm9, %v783_v42 }
 0x4c7   :  { %950 = vmatpush.bf16.msra.mxu2 %v2190_v23  ;;  %1293 = vmatpush.bf16.msra.mxu3 %v2044_v50  ;;  %v2212_v23 = vld [vmem:[#allocation19 + $0xa4] sm:$0xf0]  ;;  %v2219_v50 = vld [vmem:[#allocation19 + $0xdc] sm:$0xf0] }
 0x4c8   :  { %v1980_v52 = vor.u32 %v2219_v50, %v1979_v49  ;;  %v1989_v49 = vld [vmem:[#allocation19 + $0xe8] sm:$0xf0] }
 0x4cb   :  { %951 = vmatpush.bf16.msra.mxu2 %v2189_v19  ;;  %1294 = vmatpush.bf16.msra.mxu3 %v2020_v57  ;;  %v2209_v19 = vld [vmem:[#allocation19 + $0x94] sm:$0xf]  ;;  %v2194_v57 = vld [vmem:[#allocation19 + $0x14] sm:$0xf0] }
 0x4ed   :  { %v703_v62 = vpop.xlane.xlu1 %702 }
 0x4ee   :  { %2365 = vrcp.f32 %v703_v62 }
 0x4f3   :  { %v706_v63 = vpop.xlane.xlu2 %705 }
 0x4f4   :  { %v2366_v1 = vpop.eup %2365  ;;  %2367 = vrcp.f32 %v706_v63 }
 0x4f5   :  { %v733_v3 = vmul.f32 %v2366_v1, %v2350_v20  ;;  %v2188_v20 = vld [vmem:[#allocation17 + $0x28] sm:$0xff] }
 0x4f6   :  { %952 = vmatpush.bf16.msra.mxu2 %v2188_v20 }
 0x4f7   :  { %v741_v5 = vpack.c.bf16 %v733_v3, %v733_v3  ;;  %v1995_v3 = vld [vmem:[#allocation19 + $0xf0] sm:$0xf] }
 0x4f9   :  { %v751_v8 = vunpack.c.l.b16 %v741_v5  ;;  %v2221_v5 = vld [vmem:[#allocation19 + $0xf4] sm:$0xf] }
 0x4fa   :  { %v2368_v4 = vpop.eup %2367  ;;  %953 = vmatpush.bf16.msra.mxu2 %v2187_v21  ;;  %v1949_v21 = vld [vmem:[#allocation19 + $0xa8] sm:$0xf0] }
 0x4fb   :  { %v734_v6 = vmul.f32 %v2368_v4, %v2352_v24  ;;  %v2186_v24 = vld [vmem:[#allocation17 + $0x18] sm:$0xff]  ;;  %v2224_v4 = vld [vmem:[#allocation19 + $0x104] sm:$0xf0] }
 0x4fd   :  { %v742_v7 = vpack.c.bf16 %v734_v6, %v734_v6  ;;  %v1996_v6 = vor.u32 %v2224_v4, %v1995_v3 }
 0x4fe   :  { %954 = vmatpush.bf16.msra.mxu2 %v2186_v24  ;;  %v2027_v24 = vld [vmem:[#allocation19 + $0x128] sm:$0xf] }
 0x4ff   :  { %v752_v9 = vunpack.c.l.b16 %v742_v7  ;;  %v1997_v7 = vld [vmem:[#allocation19 + $0x108] sm:$0xf0]  ;;  %1295 = vmatpush.bf16.msra.mxu3 %v1996_v6  ;;  %v1957_v6 = vld [vmem:[#allocation19 + $0xb0] sm:$0xf0] }
 0x501   :  { %v753_v10 = vpack.c.b16 %v752_v9, %v751_v8  ;;  %v2000_v8 = vor.u32 %v2221_v5, %v1997_v7  ;;  %v2218_v9 = vld [vmem:[#allocation19 + $0xd4] sm:$0xf0]  ;;  %v2210_v5 = vld [vmem:[#allocation19 + $0x9c] sm:$0xf]  ;;  %v2059_v7 = vld [vmem:[#allocation19 + $0x160] sm:$0xf] }
 0x502   :  { %955 = vmatpush.bf16.msra.mxu2 %v2185_v26  ;;  %v2231_v26 = vld [vmem:[#allocation19 + $0x13c] sm:$0xf0] }
 0x503   :  { %1837 = vmatmul.msk.bf16.vlgmr.msrb.gmra.mxu2 %vm652_vm9, %v753_v10  ;;  %1309 = vmatpush.bf16.msrb.mxu0 %v2000_v8  ;;  %v2215_v10 = vld [vmem:[#allocation19 + $0xc4] sm:$0xf]  ;;  %v1960_v8 = vor.u32 %v2210_v5, %v1957_v6  ;;  %v1915_v6 = vld [vmem:[#allocation19 + $0x40] sm:$0xf] }
 0x506   :  { %956 = vmatpush.bf16.msra.mxu2 %v2184_v27  ;;  %v1952_v27 = vor.u32 %v2209_v19, %v1949_v21  ;;  %v2229_v19 = vld [vmem:[#allocation19 + $0x134] sm:$0xf] }
 0x50a   :  { %957 = vmatpush.bf16.msra.mxu2 %v2183_v29  ;;  %v2028_v29 = vor.u32 %v2231_v26, %v2027_v24  ;;  %v1907_v24 = vld [vmem:[#allocation19 + $0x38] sm:$0xf]  ;;  %v2201_v26 = vld [vmem:[#allocation19 + $0x4c] sm:$0xf0] }
 0x53b   :  { %v826_v12 = vpop.f32.mrf.mxu0 }
 0x53f   :  { %v848_v15 = vpop.f32.mrf.mxu1 }
 0x543   :  { %v828_v16 = vpop.f32.mrf.mxu0 }
 0x544   :  { %v2319_v17 = vpack.i.bf16 %v828_v16, %v826_v12  ;;  %v1973_v12 = vld [vmem:[#allocation19 + $0xd8] sm:$0xf0] }
 0x545   :  { %v2234_v16 = vld [vmem:[#allocation19 + $0x15c] sm:$0xf] }
 0x547   :  { %v850_v25 = vpop.f32.mrf.mxu1 }
 0x548   :  { %v2324_v18 = vpack.i.bf16 %v850_v25, %v848_v15 }
 0x549   :  { %v796_v11 = vpop.f32.mrf.mxu3 }
 0x551   :  { %v798_v13 = vpop.f32.mrf.mxu3 }
 0x552   :  { %v2314_v14 = vpack.i.bf16 %v798_v13, %v796_v11  ;;  %v2051_v13 = vld [vmem:[#allocation19 + $0x158] sm:$0xf] }
 0x554   :  { %2315 = vrot.lane.b32.xlu0 %v2314_v14, %s2749_s4  ;;  %v1976_v14 = vor.u32 %v2215_v10, %v1973_v12  ;;  %v2061_v10 = vld [vmem:[#allocation19 + $0x178] sm:$0xf0] }
 0x556   :  { %1310 = vmatpush.bf16.msrb.mxu0 %v1976_v14  ;;  %v2204_v14 = vld [vmem:[#allocation19 + $0x6c] sm:$0xf] }
 0x55a   :  { %1311 = vmatpush.bf16.msrb.mxu0 %v1952_v27  ;;  %v2198_v27 = vld [vmem:[#allocation19 + $0x3c] sm:$0xf] }
 0x55c   :  { %2320 = vrot.lane.b32.xlu0 %v2319_v17, %s2732_s25  ;;  %v2053_v17 = vld [vmem:[#allocation19 + $0x170] sm:$0xf0] }
 0x55d   :  { %v2056_v25 = vor.u32 %v2234_v16, %v2053_v17  ;;  %v1933_v16 = vld [vmem:[#allocation19 + $0x80] sm:$0xf0]  ;;  %v2035_v17 = vld [vmem:[#allocation19 + $0x130] sm:$0xf] }
 0x55f   :  { %1335 = vmatpush.bf16.msrb.mxu2 %v2056_v25  ;;  %v2232_v25 = vld [vmem:[#allocation19 + $0x144] sm:$0xf0] }
 0x564   :  { %2325 = vrot.lane.b32.xlu0 %v2324_v18, %s2748_s7  ;;  %v1947_v18 = vld [vmem:[#allocation19 + $0x90] sm:$0xf] }
 0x565   :  { %v1948_v20 = vor.u32 %v2212_v23, %v1947_v18  ;;  %v1936_v18 = vor.u32 %v2204_v14, %v1933_v16  ;;  %v2036_v23 = vor.u32 %v2232_v25, %v2035_v17  ;;  %v1893_v16 = vld [vmem:[#allocation19 + $0x28] sm:$0xf0] }
 0x586   :  { %v774_v31 = vpop.f32.mrf.mxu2 }
 0x58e   :  { %v776_v35 = vpop.f32.mrf.mxu2 }
 0x5c6   :  { %v2316_v30 = vpop.permute.xlu0 %2315 }
 0x5c7   :  { %v2318_v22 = vunpack.i.h.bf16 %v2316_v30  ;;  %v2317_v32 = vunpack.i.l.bf16 %v2316_v30  ;;  %v2228_v30 = vld [vmem:[#allocation19 + $0x12c] sm:$0xf] }
 0x5c9   :  { %v877_v37 = vsel %vm557_vm8, %v774_v31, %v2317_v32  ;;  %v878_v38 = vsel %vm557_vm8, %v776_v35, %v2318_v22  ;;  %v2029_v31 = vld [vmem:[#allocation19 + $0x140] sm:$0xf0]  ;;  %v1923_v22 = vld [vmem:[#allocation19 + $0x60] sm:$0xf]  ;;  %v2206_v32 = vld [vmem:[#allocation19 + $0x74] sm:$0xf0] }
 0x5ca   :  { %v1925_v35 = vld [vmem:[#allocation19 + $0x78] sm:$0xf0] }
 0x5ce   :  { %v2321_v28 = vpop.permute.xlu0 %2320 }
 0x5cf   :  { %v2323_v33 = vunpack.i.h.bf16 %v2321_v28  ;;  %v2322_v34 = vunpack.i.l.bf16 %v2321_v28  ;;  %v2032_v28 = vor.u32 %v2228_v30, %v2029_v31  ;;  %v1909_v30 = vld [vmem:[#allocation19 + $0x50] sm:$0xf0]  ;;  %v2011_v31 = vld [vmem:[#allocation19 + $0x100] sm:$0xf] }
 0x5d1   :  { %v880_v41 = vsel %vm879_vm10, %v877_v37, %v2322_v34  ;;  %v881_v43 = vsel %vm879_vm10, %v878_v38, %v2323_v33  ;;  %v2203_v33 = vld [vmem:[#allocation19 + $0x64] sm:$0xf]  ;;  %1336 = vmatpush.bf16.msrb.mxu2 %v2032_v28  ;;  %v1924_v34 = vor.u32 %v2206_v32, %v1923_v22  ;;  %v2225_v37 = vld [vmem:[#allocation19 + $0x10c] sm:$0xf0]  ;;  %v2226_v28 = vld [vmem:[#allocation19 + $0x114] sm:$0xf0]  ;;  %v1912_v22 = vor.u32 %v2198_v27, %v1909_v30 }
 0x5d2   :  { %v1928_v38 = vor.u32 %v2203_v33, %v1925_v35  ;;  %v2012_v32 = vor.u32 %v2226_v28, %v2011_v31  ;;  %v2223_v33 = vld [vmem:[#allocation19 + $0x104] sm:$0xf]  ;;  %v2330_v31 = vld [vmem:[%s3151_s13] ss:$0 sm:$0xff]  ;;  %s2750_s13 = smov [#allocation22]  }
 0x5d3   :  { %s1748_s20 = sshll.u32 %s2750_s13, 4  ;;  %s1749_s20 = int_to_ptr.vmem [resolvable:$true] %s1748_s20 }
 0x5d4   :  { %1312 = vmatpush.bf16.msrb.mxu0 %v1928_v38  ;;  %v2195_v38 = vld [vmem:[#allocation19 + $0x1c] sm:$0xf0] }
 0x5d6   :  { %v2326_v36 = vpop.permute.xlu0 %2325 }
 0x5d7   :  { %v2328_v39 = vunpack.i.h.bf16 %v2326_v36  ;;  %v2327_v40 = vunpack.i.l.bf16 %v2326_v36  ;;  %v2003_v36 = vld [vmem:[#allocation19 + $0xf8] sm:$0xf] }
 0x5d9   :  { %v883_v44 = vsel %vm882_vm11, %v880_v41, %v2327_v40  ;;  %v884_v45 = vsel %vm882_vm11, %v881_v43, %v2328_v39  ;;  %v2004_v39 = vor.u32 %v2225_v37, %v2003_v36  ;;  %v2222_v40 = vld [vmem:[#allocation19 + $0xfc] sm:$0xf]  ;;  %v2005_v41 = vld [vmem:[#allocation19 + $0x110] sm:$0xf0]  ;;  %v1883_v37 = vld [vmem:[#allocation19 + $0x8] sm:$0xf] }
 0x5da   :  { %v885_v46 = vpack.c.bf16 %v884_v45, %v883_v44  ;;  %v2008_v43 = vor.u32 %v2222_v40, %v2005_v41  ;;  %v1899_v44 = vld [vmem:[#allocation19 + $0x30] sm:$0xf]  ;;  %v2200_v45 = vld [vmem:[#allocation19 + $0x44] sm:$0xf0]  ;;  %v1884_v41 = vor.u32 %v2195_v38, %v1883_v37  ;;  %v2262_v37 = vld [vmem:[#allocation20 + $0xb8] sm:$0xff] }
 0x5db   :  { %v1900_v47 = vor.u32 %v2200_v45, %v1899_v44  ;;  %v1987_v44 = vld [vmem:[#allocation19 + $0xd0] sm:$0xf]  ;;  %v2220_v45 = vld [vmem:[#allocation19 + $0xe4] sm:$0xf0] }
 0x5dc   :  { %958 = vmatmul.bf16.vlgmr.msra.gmra.mxu2 %v885_v46  ;;  %v2197_v46 = vld [vmem:[#allocation19 + $0x34] sm:$0xf] }
 0x5dd   :  { %1337 = vmatpush.bf16.msrb.mxu2 %v2008_v43  ;;  %v1904_v51 = vor.u32 %v2197_v46, %v1901_v48  ;;  %v1885_v43 = vld [vmem:[#allocation19 + $0x20] sm:$0xf0]  ;;  %v2217_v48 = vld [vmem:[#allocation19 + $0xd4] sm:$0xf] }
 0x5de   :  { %v2253_v38 = vld [vmem:[#allocation20 + $0x70] sm:$0xff] }
 0x5df   :  { %1313 = vmatpush.bf16.msrb.mxu0 %v1904_v51  ;;  %v1992_v51 = vor.u32 %v2217_v48, %v1989_v49 }
 0x5e1   :  { %1338 = vmatpush.bf16.msrb.mxu2 %v1984_v58 }
 0x5e5   :  { %1339 = vmatpush.bf16.msrb.mxu2 %v1960_v8  ;;  %v2199_v8 = vld [vmem:[#allocation19 + $0x44] sm:$0xf] }
 0x5e9   :  { %1340 = vmatpush.bf16.msrb.mxu2 %v1936_v18 }
 0x5ed   :  { %1341 = vmatpush.bf16.msrb.mxu2 %v1912_v22 }
 0x65f   :  { %v959_v60 = vpop.f32.mrf.mxu2 }
 0x660   :  { %v3001_v61 = vadd.f32 %v959_v60, %v2895_v0  ;;  %v1971_v0 = vld [vmem:[#allocation19 + $0xc0] sm:$0xf]  ;;  %v1876_v60 = vor.u32 %v2194_v57, %v1875_v59  ;;  %v1965_v59 = vld [vmem:[#allocation19 + $0xb8] sm:$0xf0] }
 0x661   :  { %v1972_v11 = vor.u32 %v2218_v9, %v1971_v0  ;;  %v2238_v0 = vld [vmem:[#allocation19 + $0x174] sm:$0xf0]  ;;  %v2235_v9 = vld [vmem:[#allocation19 + $0x164] sm:$0xf]  ;;  %v1968_v57 = vor.u32 %v2211_v55, %v1965_v59  ;;  %v2257_v59 = vld [vmem:[#allocation20 + $0x90] sm:$0xff] }
 0x662   :  { %v966_v42 = vmul.f32 %v3001_v61, %v3001_v61  ;;  %v2064_v12 = vor.u32 %v2235_v9, %v2061_v10  ;;  %v2243_v55 = vld [vmem:[#allocation20 + $0x20] sm:$0xff] }
 0x663   :  { %1296 = vmatpush.bf16.msra.mxu3 %v1972_v11  ;;  %v2060_v11 = vor.u32 %v2238_v0, %v2059_v7  ;;  %v2202_v7 = vld [vmem:[#allocation19 + $0x54] sm:$0xf0]  ;;  %v1917_v0 = vld [vmem:[#allocation19 + $0x58] sm:$0xf0] }
 0x664   :  { %968 = vadd.xlane.f32.xlu1 %v966_v42  ;;  %v1877_v42 = vld [vmem:[#allocation19 + $0x18] sm:$0xf0] }
 0x665   :  { %v1880_v3 = vor.u32 %v2191_v53, %v1877_v42  ;;  %v1939_v53 = vld [vmem:[#allocation19 + $0x70] sm:$0xf]  ;;  %v2205_v42 = vld [vmem:[#allocation19 + $0x74] sm:$0xf] }
 0x667   :  { %v961_v62 = vpop.f32.mrf.mxu2  ;;  %1297 = vmatpush.bf16.msra.mxu3 %v1948_v20  ;;  %1314 = vmatpush.bf16.msrb.mxu0 %v1880_v3  ;;  %v2037_v20 = vld [vmem:[#allocation19 + $0x148] sm:$0xf0] }
 0x668   :  { %v3006_v63 = vadd.f32 %v961_v62, %v2899_v2  ;;  %v2237_v2 = vld [vmem:[#allocation19 + $0x16c] sm:$0xf0]  ;;  %v1955_v62 = vld [vmem:[#allocation19 + $0x98] sm:$0xf]  ;;  %v2040_v21 = vor.u32 %v2229_v19, %v2037_v20 }
 0x669   :  { %v2052_v15 = vor.u32 %v2237_v2, %v2051_v13  ;;  %v1931_v13 = vld [vmem:[#allocation19 + $0x68] sm:$0xf]  ;;  %v2207_v2 = vld [vmem:[#allocation19 + $0x7c] sm:$0xf0] }
 0x66a   :  { %v967_v1 = vmul.f32 %v3006_v63, %v3006_v63 }
 0x66b   :  { %1321 = vmatpush.bf16.msrb.mxu1 %v2052_v15  ;;  %1298 = vmatpush.bf16.msra.mxu3 %v1924_v34  ;;  %v1932_v15 = vor.u32 %v2207_v2, %v1931_v13  ;;  %v2013_v34 = vld [vmem:[#allocation19 + $0x118] sm:$0xf0]  ;;  %v1920_v13 = vor.u32 %v2199_v8, %v1917_v0  ;;  %v1891_v2 = vld [vmem:[#allocation19 + $0x10] sm:$0xf] }
 0x66c   :  { %970 = vadd.xlane.f32.xlu0 %v967_v1  ;;  %v2213_v1 = vld [vmem:[#allocation19 + $0xac] sm:$0xf0]  ;;  %1363 = vmatpush.bf16.msra.mxu0 %v2064_v12  ;;  %v2016_v35 = vor.u32 %v2223_v33, %v2013_v34  ;;  %v1916_v12 = vor.u32 %v2202_v7, %v1915_v6 }
 0x66d   :  { %v1956_v4 = vor.u32 %v2213_v1, %v1955_v62  ;;  %v1941_v62 = vld [vmem:[#allocation19 + $0x88] sm:$0xf0] }
 0x66e   :  { %v1944_v5 = vor.u32 %v2205_v42, %v1941_v62 }
 0x66f   :  { %1322 = vmatpush.bf16.msrb.mxu1 %v2028_v29  ;;  %1299 = vmatpush.bf16.msra.mxu3 %v1900_v47  ;;  %v1908_v29 = vor.u32 %v2201_v26, %v1907_v24  ;;  %v1988_v47 = vor.u32 %v2220_v45, %v1987_v44  ;;  %v2245_v44 = vld [vmem:[#allocation20 + $0x30] sm:$0xff]  ;;  %v2251_v45 = vld [vmem:[#allocation20 + $0x60] sm:$0xff] }
 0x670   :  { %1364 = vmatpush.bf16.msra.mxu0 %v2040_v21 }
 0x673   :  { %1323 = vmatpush.bf16.msrb.mxu1 %v2004_v39  ;;  %1300 = vmatpush.bf16.msra.mxu3 %v1876_v60  ;;  %v2192_v39 = vld [vmem:[#allocation19 + $0xc] sm:$0xf]  ;;  %v2208_v60 = vld [vmem:[#allocation19 + $0x84] sm:$0xf0] }
 0x674   :  { %1365 = vmatpush.bf16.msra.mxu0 %v2016_v35  ;;  %v1888_v46 = vor.u32 %v2192_v39, %v1885_v43  ;;  %v2261_v39 = vld [vmem:[#allocation20 + $0xb0] sm:$0xff]  ;;  %v2260_v43 = vld [vmem:[#allocation20 + $0xa8] sm:$0xff] }
 0x676   :  { %1342 = vmatpush.bf16.msrb.mxu2 %v1888_v46  ;;  %v2259_v46 = vld [vmem:[#allocation20 + $0xa0] sm:$0xff] }
 0x677   :  { %1324 = vmatpush.bf16.msrb.mxu1 %v1980_v52  ;;  %1349 = vmatpush.bf16.msrb.mxu3 %v2060_v11  ;;  %v1963_v52 = vld [vmem:[#allocation19 + $0xa0] sm:$0xf] }
 0x678   :  { %1366 = vmatpush.bf16.msra.mxu0 %v1992_v51  ;;  %v1964_v58 = vor.u32 %v2214_v54, %v1963_v52  ;;  %v2250_v51 = vld [vmem:[#allocation20 + $0x58] sm:$0xff] }
 0x679   :  { %v2258_v52 = vld [vmem:[#allocation20 + $0x98] sm:$0xff] }
 0x67b   :  { %1325 = vmatpush.bf16.msrb.mxu1 %v1956_v4  ;;  %1350 = vmatpush.bf16.msrb.mxu3 %v2036_v23  ;;  %v1940_v4 = vor.u32 %v2208_v60, %v1939_v53  ;;  %v2242_v60 = vld [vmem:[#allocation20 + $0x18] sm:$0xff] }
 0x67c   :  { %1367 = vmatpush.bf16.msra.mxu0 %v1968_v57 }
 0x67f   :  { %1326 = vmatpush.bf16.msrb.mxu1 %v1932_v15  ;;  %1351 = vmatpush.bf16.msrb.mxu3 %v2012_v32  ;;  %v2196_v15 = vld [vmem:[#allocation19 + $0x24] sm:$0xf0] }
 0x680   :  { %1368 = vmatpush.bf16.msra.mxu0 %v1944_v5  ;;  %v1892_v25 = vor.u32 %v2196_v15, %v1891_v2  ;;  %v2256_v5 = vld [vmem:[#allocation20 + $0x88] sm:$0xff] }
 0x683   :  { %1327 = vmatpush.bf16.msrb.mxu1 %v1908_v29  ;;  %1352 = vmatpush.bf16.msrb.mxu3 %v1988_v47  ;;  %v2244_v47 = vld [vmem:[#allocation20 + $0x28] sm:$0xff] }
 0x684   :  { %1369 = vmatpush.bf16.msra.mxu0 %v1920_v13 }
 0x687   :  { %1328 = vmatpush.bf16.msrb.mxu1 %v1884_v41  ;;  %1353 = vmatpush.bf16.msrb.mxu3 %v1964_v58  ;;  %v2252_v41 = vld [vmem:[#allocation20 + $0x68] sm:$0xff]  ;;  %v2249_v58 = vld [vmem:[#allocation20 + $0x50] sm:$0xff] }
 0x68b   :  { %1354 = vmatpush.bf16.msrb.mxu3 %v1940_v4  ;;  %v2248_v4 = vld [vmem:[#allocation20 + $0x48] sm:$0xff] }
 0x68f   :  { %1355 = vmatpush.bf16.msrb.mxu3 %v1916_v12 }
 0x693   :  { %1356 = vmatpush.bf16.msrb.mxu3 %v1892_v25 }
 0x6d7   :  { %v969_v36 = vpop.xlane.xlu1 %968 }
 0x6d8   :  { %v972_v40 = vmul.f32 %v969_v36, %v2903_v56  ;;  %v2254_v36 = vld [vmem:[#allocation20 + $0x78] sm:$0xff] }
 0x6d9   :  { %1712 = vmatpush.bf16.msra.mxu2 %v2254_v36 }
 0x6da   :  { %v974_v50 = vadd.f32 1e-05, %v972_v40  ;;  %v2246_v40 = vld [vmem:[#allocation20 + $0x38] sm:$0xff] }
 0x6db   :  { %1698 = vmatpush.bf16.msra.mxu1 %v2246_v40 }
 0x6dc   :  { %2369 = vrsqrt.f32 %v974_v50  ;;  %vm982_vm13 = vweird.f32 %v974_v50 }
 0x6dd   :  { %1713 = vmatpush.bf16.msra.mxu2 %v2253_v38 }
 0x6df   :  { %v971_v1 = vpop.xlane.xlu0 %970  ;;  %1699 = vmatpush.bf16.msra.mxu1 %v2245_v44 }
 0x6e0   :  { %v973_v3 = vmul.f32 %v971_v1, %v2903_v56  ;;  %v2193_v56 = vld [vmem:[#allocation19 + $0x14] sm:$0xf] }
 0x6e1   :  { %v1896_v18 = vor.u32 %v2193_v56, %v1893_v16  ;;  %1714 = vmatpush.bf16.msra.mxu2 %v2252_v41 }
 0x6e2   :  { %v2370_v9 = vpop.eup %2369  ;;  %v975_v10 = vadd.f32 1e-05, %v973_v3 }
 0x6e3   :  { %v977_v11 = vmul.f32 %v2370_v9, %v974_v50  ;;  %1370 = vmatpush.bf16.msra.mxu0 %v1896_v18  ;;  %vm983_vm12 = vweird.f32 %v2370_v9  ;;  %1700 = vmatpush.bf16.msra.mxu1 %v2244_v47 }
 0x6e4   :  { %2371 = vrsqrt.f32 %v975_v10  ;;  %vm984_vm14 = vmor %vm982_vm13, %vm983_vm12  ;;  %vm992_vm0 = vweird.f32 %v975_v10 }
 0x6e5   :  { %v978_v14 = vmul.f32 %v2370_v9, %v977_v11  ;;  %1715 = vmatpush.bf16.msra.mxu2 %v2251_v45  ;;  %v2255_v11 = vld [vmem:[#allocation20 + $0x80] sm:$0xff] }
 0x6e7   :  { %v979_v17 = vmul.f32 0.5, %v978_v14  ;;  %1701 = vmatpush.bf16.msra.mxu1 %v2243_v55  ;;  %v2240_v14 = vld [vmem:[#allocation20 + $0x8] sm:$0xff] }
 0x6e9   :  { %v980_v23 = vsub.f32 1.5, %v979_v17  ;;  %1716 = vmatpush.bf16.msra.mxu2 %v2250_v51 }
 0x6ea   :  { %v2372_v19 = vpop.eup %2371 }
 0x6eb   :  { %v987_v20 = vmul.f32 %v2372_v19, %v975_v10  ;;  %v981_v21 = vmul.f32 %v2370_v9, %v980_v23  ;;  %vm993_vm15 = vweird.f32 %v2372_v19  ;;  %1702 = vmatpush.bf16.msra.mxu1 %v2242_v60  ;;  %v2247_v10 = vld [vmem:[#allocation20 + $0x40] sm:$0xff] }
 0x6ec   :  { %vm994_vm1 = vmor %vm992_vm0, %vm993_vm15  ;;  %v2239_v23 = vld [vmem:[#allocation20] sm:$0xff] }
 0x6ed   :  { %v988_v24 = vmul.f32 %v2372_v19, %v987_v20  ;;  %v985_v27 = vsel %vm984_vm14, %v2370_v9, %v981_v21  ;;  %1717 = vmatpush.bf16.msra.mxu2 %v2249_v58  ;;  %v2241_v9 = vld [vmem:[#allocation20 + $0x10] sm:$0xff] }
 0x6ee   :  { %v996_v28 = vmul.f32 %v985_v27, %v3001_v61 }
 0x6ef   :  { %v989_v26 = vmul.f32 0.5, %v988_v24  ;;  %1703 = vmatpush.bf16.msra.mxu1 %v2241_v9 }
 0x6f0   :  { %v1002_v33 = vmul.f32 %v2330_v31, %v996_v28 }
 0x6f1   :  { %v990_v29 = vsub.f32 1.5, %v989_v26  ;;  %1718 = vmatpush.bf16.msra.mxu2 %v2248_v4 }
 0x6f3   :  { %v991_v30 = vmul.f32 %v2372_v19, %v990_v29  ;;  %1704 = vmatpush.bf16.msra.mxu1 %v2240_v14 }
 0x6f5   :  { %v995_v22 = vsel %vm994_vm1, %v2372_v19, %v991_v30  ;;  %1719 = vmatpush.bf16.msra.mxu2 %v2247_v10 }
 0x6f6   :  { %v997_v32 = vmul.f32 %v995_v22, %v3006_v63 }
 0x6f7   :  { %1705 = vmatpush.bf16.msra.mxu1 %v2239_v23 }
 0x6f8   :  { %v1003_v34 = vmul.f32 %v2330_v31, %v997_v32 }
 0x6fa   :  { %v1004_v35 = vpack.c.bf16 %v1003_v34, %v1002_v33 }
 0x6fc   :  { %1301 = vmatmul.bf16.vlgmr.msra.gmra.mxu3 %v1004_v35  ;;  %1315 = vmatmul.bf16.vlgmr.msrb.gmra.mxu0 %v1004_v35 }
 0x6fd   :  { %1329 = vmatmul.bf16.vlgmr.msrb.gmra.mxu1 %v1004_v35  ;;  %1343 = vmatmul.bf16.vlgmr.msrb.gmra.mxu2 %v1004_v35 }
 0x6fe   :  { %1726 = vmatpush.bf16.msra.mxu3 %v2262_v37 }
 0x702   :  { %1727 = vmatpush.bf16.msra.mxu3 %v2261_v39 }
 0x706   :  { %1728 = vmatpush.bf16.msra.mxu3 %v2260_v43 }
 0x70a   :  { %1729 = vmatpush.bf16.msra.mxu3 %v2259_v46 }
 0x70c   :  { %1357 = vmatmul.bf16.vlgmr.msrb.gmra.mxu3 %v1004_v35  ;;  %1371 = vmatmul.bf16.vlgmr.msra.gmra.mxu0 %v1004_v35 }
 0x70e   :  { %1730 = vmatpush.bf16.msra.mxu3 %v2258_v52 }
 0x712   :  { %1731 = vmatpush.bf16.msra.mxu3 %v2257_v59 }
 0x716   :  { %1732 = vmatpush.bf16.msra.mxu3 %v2256_v5 }
 0x71a   :  { %1733 = vmatpush.bf16.msra.mxu3 %v2255_v11 }
 0x779   :  { %v3017_v48 = vpop.f32.mrf.mxu0 }
 0x77a   :  { %v2066_v49 = vmul.f32 -1.442695, %v3017_v48  ;;  %v3020_v50 = vpop.f32.mrf.mxu1 }
 0x77b   :  { %v2067_v54 = vmul.f32 -1.442695, %v3020_v50 }
 0x77c   :  { %2373 = vpow2.f32 %v2066_v49 }
 0x77d   :  { %2375 = vpow2.f32 %v2067_v54 }
 0x77f   :  { %v3023_v57 = vpop.f32.mrf.mxu3 }
 0x780   :  { %v2065_v53 = vmul.f32 -1.442695, %v3023_v57 }
 0x781   :  { %v3026_v42 = vpop.f32.mrf.mxu0 }
 0x782   :  { %v2374_v62 = vpop.eup %2373  ;;  %2377 = vpow2.f32 %v2065_v53  ;;  %v2069_v1 = vmul.f32 -1.442695, %v3026_v42  ;;  %v3029_v3 = vpop.f32.mrf.mxu1 }
 0x783   :  { %v2376_v6 = vpop.eup %2375  ;;  %v1396_v7 = vadd.f32 1.0, %v2374_v62  ;;  %v2070_v8 = vmul.f32 -1.442695, %v3029_v3 }
 0x784   :  { %v3032_v0 = vadd.f32 1.0, %v2376_v6  ;;  %2379 = vpow2.f32 %v2069_v1 }
 0x785   :  { %2381 = vrcp.f32 %v1396_v7  ;;  %v1425_v31 = vand.u32 2147483647, %v1396_v7  ;;  %v1427_v28 = vand.u32 2147483648, %v1396_v7  ;;  %vm1421_vm3 = vweird.f32 %v1396_v7 }
 0x786   :  { %2383 = vrcp.f32 %v3032_v0  ;;  %v1440_v32 = vand.u32 2147483647, %v3032_v0  ;;  %v1442_v35 = vand.u32 2147483648, %v3032_v0  ;;  %vm1436_vm5 = vweird.f32 %v3032_v0 }
 0x787   :  { %2385 = vpow2.f32 %v2070_v8  ;;  %v3035_v12 = vpop.f32.mrf.mxu3  ;;  %vm3060_vm4 = vcmp.eq.f32.partialorder %v1425_v31, 8.507059e+37  ;;  %v1428_v40 = vor.u32 1.1754944e-38, %v1427_v28 }
 0x788   :  { %v2378_v13 = vpop.eup %2377  ;;  %v2068_v2 = vmul.f32 -1.442695, %v3035_v12  ;;  %vm3072_vm8 = vcmp.eq.f32.partialorder %v1440_v32, 8.507059e+37  ;;  %v1443_v52 = vor.u32 1.1754944e-38, %v1442_v35 }
 0x789   :  { %v3038_v15 = vadd.f32 1.0, %v2378_v13  ;;  %v1372_v4 = vpop.f32.mrf.mxu0 }
 0x78a   :  { %v2380_v56 = vpop.eup %2379  ;;  %2387 = vpow2.f32 %v2068_v2 }
 0x78b   :  { %v2382_v16 = vpop.eup %2381  ;;  %2389 = vrcp.f32 %v3038_v15  ;;  %v3043_v18 = vadd.f32 1.0, %v2380_v56  ;;  %v1410_v46 = vand.u32 2147483647, %v3038_v15  ;;  %vm1406_vm9 = vweird.f32 %v3038_v15 }
 0x78c   :  { %v3041_v17 = vpop.eup %2383  ;;  %v1417_v25 = vmul.f32 %v2382_v16, %v1396_v7  ;;  %vm1422_vm2 = vweird.f32 %v2382_v16  ;;  %v1412_v60 = vand.u32 2147483648, %v3038_v15 }
 0x78d   :  { %v2386_v19 = vpop.eup %2385  ;;  %v1432_v20 = vmul.f32 %v3041_v17, %v3032_v0  ;;  %2391 = vrcp.f32 %v3043_v18  ;;  %vm3066_vm6 = vmor %vm1421_vm3, %vm1422_vm2  ;;  %vm1437_vm7 = vweird.f32 %v3041_v17  ;;  %v1472_v58 = vand.u32 2147483648, %v3043_v18 }
 0x78e   :  { %v1418_v21 = vsub.f32 1.0, %v1417_v25  ;;  %v3048_v26 = vadd.f32 1.0, %v2386_v19  ;;  %vm3086_vm10 = vmor %vm1436_vm5, %vm1437_vm7  ;;  %v1470_v1 = vand.u32 2147483647, %v3043_v18  ;;  %vm3097_vm12 = vcmp.eq.f32.partialorder %v1410_v46, 8.507059e+37 }
 0x78f   :  { %v1433_v24 = vsub.f32 1.0, %v1432_v20  ;;  %v1358_v47 = vpop.f32.mrf.mxu3  ;;  %vm1466_vm13 = vweird.f32 %v3043_v18  ;;  %v1473_v13 = vor.u32 1.1754944e-38, %v1472_v58  ;;  %v1413_v20 = vor.u32 1.1754944e-38, %v1412_v60 }
 0x790   :  { %v2388_v27 = vpop.eup %2387  ;;  %v1419_v29 = vmul.f32 %v2382_v16, %v1418_v21  ;;  %2393 = vrcp.f32 %v3048_v26  ;;  %v1485_v9 = vand.u32 2147483647, %v3048_v26  ;;  %v1487_v10 = vand.u32 2147483648, %v3048_v26  ;;  %v1344_v21 = vpop.f32.mrf.mxu2 }
 0x791   :  { %v3050_v30 = vpop.eup %2389  ;;  %v1434_v22 = vmul.f32 %v3041_v17, %v1433_v24  ;;  %v3058_v36 = vadd.f32 1.0, %v2388_v27  ;;  %vm1471_vm1 = vcmp.eq.f32.partialorder %v1470_v1, 8.507059e+37  ;;  %vm1481_vm3 = vweird.f32 %v3048_v26 }
 0x792   :  { %v1402_v33 = vmul.f32 %v3050_v30, %v3038_v15  ;;  %v1420_v34 = vadd.f32 %v2382_v16, %v1419_v29  ;;  %vm1407_vm14 = vweird.f32 %v3050_v30  ;;  %vm1486_vm5 = vcmp.eq.f32.partialorder %v1485_v9, 8.507059e+37 }
 0x793   :  { %v2392_v37 = vpop.eup %2391  ;;  %v1435_v44 = vadd.f32 %v3041_v17, %v1434_v22  ;;  %2395 = vrcp.f32 %v3058_v36  ;;  %vm3111_vm2 = vmor %vm1406_vm9, %vm1407_vm14  ;;  %v1488_v24 = vor.u32 1.1754944e-38, %v1487_v10  ;;  %v1455_v35 = vand.u32 2147483647, %v3058_v36 }
 0x794   :  { %v1403_v38 = vsub.f32 1.0, %v1402_v33  ;;  %v1462_v41 = vmul.f32 %v2392_v37, %v3043_v18  ;;  %v1424_v51 = vsel %vm3066_vm6, %v2382_v16, %v1420_v34  ;;  %vm1467_vm11 = vweird.f32 %v2392_v37 }
 0x795   :  { %v1429_v5 = vsel %vm3060_vm4, %v1428_v40, %v1424_v51  ;;  %v1439_v6 = vsel %vm3086_vm10, %v3041_v17, %v1435_v44  ;;  %vm1468_vm15 = vmor %vm1466_vm13, %vm1467_vm11  ;;  %vm1451_vm7 = vweird.f32 %v3058_v36  ;;  %vm1456_vm9 = vcmp.eq.f32.partialorder %v1455_v35, 8.507059e+37 }
 0x796   :  { %v2394_v49 = vpop.eup %2393  ;;  %v1463_v54 = vsub.f32 1.0, %v1462_v41  ;;  %v1404_v55 = vmul.f32 %v3050_v30, %v1403_v38  ;;  %v1492_v56 = vmul.f32 %v1429_v5, %v3017_v48  ;;  %v1444_v16 = vsel %vm3072_vm8, %v1443_v52, %v1439_v6 }
 0x797   :  { %v1477_v59 = vmul.f32 %v2394_v49, %v3048_v26  ;;  %vm1482_vm0 = vweird.f32 %v2394_v49  ;;  %v1493_v27 = vmul.f32 %v1444_v16, %v3020_v50  ;;  %v1360_v28 = vpop.f32.mrf.mxu3  ;;  %v1457_v26 = vand.u32 2147483648, %v3058_v36 }
 0x798   :  { %v1464_v62 = vmul.f32 %v2392_v37, %v1463_v54  ;;  %v1405_v11 = vadd.f32 %v3050_v30, %v1404_v55  ;;  %vm1483_vm4 = vmor %vm1481_vm3, %vm1482_vm0  ;;  %v1498_v32 = vmul.f32 %v1492_v56, %v1358_v47  ;;  %v1346_v47 = vpop.f32.mrf.mxu2 }
 0x799   :  { %v1478_v8 = vsub.f32 1.0, %v1477_v59  ;;  %v2396_v14 = vpop.eup %2395  ;;  %v1499_v39 = vmul.f32 %v1493_v27, %v1372_v4  ;;  %v1458_v41 = vor.u32 1.1754944e-38, %v1457_v26 }
 0x79a   :  { %v1465_v0 = vadd.f32 %v2392_v37, %v1464_v62  ;;  %v1447_v19 = vmul.f32 %v2396_v14, %v3058_v36  ;;  %v1409_v15 = vsel %vm3111_vm2, %v3050_v30, %v1405_v11  ;;  %vm1452_vm6 = vweird.f32 %v2396_v14 }
 0x79b   :  { %v1479_v2 = vmul.f32 %v2394_v49, %v1478_v8  ;;  %v1414_v50 = vsel %vm3097_vm12, %v1413_v20, %v1409_v15  ;;  %vm1453_vm8 = vmor %vm1451_vm7, %vm1452_vm6 }
 0x79c   :  { %v1469_v17 = vsel %vm1468_vm15, %v2392_v37, %v1465_v0  ;;  %v1448_v31 = vsub.f32 1.0, %v1447_v19  ;;  %v1374_v37 = vpop.f32.mrf.mxu0  ;;  %v1491_v43 = vmul.f32 %v1414_v50, %v3023_v57 }
 0x79d   :  { %v1474_v18 = vsel %vm1471_vm1, %v1473_v13, %v1469_v17  ;;  %v1480_v23 = vadd.f32 %v2394_v49, %v1479_v2 }
 0x79e   :  { %v1495_v48 = vmul.f32 %v1474_v18, %v3026_v42  ;;  %v1449_v42 = vmul.f32 %v2396_v14, %v1448_v31 }
 0x79f   :  { %v1484_v29 = vsel %vm1483_vm4, %v2394_v49, %v1480_v23  ;;  %v1497_v49 = vmul.f32 %v1491_v43, %v1344_v21 }
 0x7a0   :  { %v1489_v22 = vsel %vm1486_vm5, %v1488_v24, %v1484_v29  ;;  %v1501_v33 = vmul.f32 %v1495_v48, %v1360_v28  ;;  %v1450_v30 = vadd.f32 %v2396_v14, %v1449_v42 }
 0x7a1   :  { %v1496_v34 = vmul.f32 %v1489_v22, %v3029_v3 }
 0x7a2   :  { %v1504_v38 = vpack.c.bf16 %v1501_v33, %v1498_v32  ;;  %v1454_v3 = vsel %vm1453_vm8, %v2396_v14, %v1450_v30 }
 0x7a3   :  { %v1502_v40 = vmul.f32 %v1496_v34, %v1374_v37  ;;  %v1459_v45 = vsel %vm1456_vm9, %v1458_v41, %v1454_v3 }
 0x7a4   :  { %1720 = vmatmul.bf16.vlgmr.msra.gmra.mxu2 %v1504_v38  ;;  %v1494_v46 = vmul.f32 %v1459_v45, %v3035_v12 }
 0x7a5   :  { %v1505_v44 = vpack.c.bf16 %v1502_v40, %v1499_v39 }
 0x7a6   :  { %v1500_v51 = vmul.f32 %v1494_v46, %v1346_v47 }
 0x7a7   :  { %1734 = vmatmul.bf16.vlgmr.msra.gmra.mxu3 %v1505_v44 }
 0x7a8   :  { %v1503_v52 = vpack.c.bf16 %v1500_v51, %v1497_v49 }
 0x7aa   :  { %1706 = vmatmul.bf16.vlgmr.msra.gmra.mxu1 %v1503_v52 }
 0x827   :  { %v1721_v36 = vpop.f32.mrf.mxu2  ;;  %v1707_v54 = vpop.f32.mrf.mxu1 }
 0x828   :  { %v1722_v58 = vadd.f32 %v1721_v36, %v1707_v54 }
 0x82a   :  { %v1735_v55 = vpop.f32.mrf.mxu3 }
 0x82b   :  { %v1736_v59 = vadd.f32 %v1735_v55, %v1722_v58 }
 0x82d   :  { %v1740_v53 = vadd.f32 %v1736_v59, %v3001_v61 }
 0x82f   :  { %v1723_v57 = vpop.f32.mrf.mxu2  ;;  %1742 = vst [vmem:[#allocation22] sm:$0xff] %v1740_v53  ;;  %v1709_v60 = vpop.f32.mrf.mxu1 }
 0x830   :  { %v1724_v62 = vadd.f32 %v1723_v57, %v1709_v60 }
 0x832   :  { %v1737_v1 = vpop.f32.mrf.mxu3 }
 0x833   :  { %v1738_v12 = vadd.f32 %v1737_v1, %v1724_v62 }
 0x835   :  { %v1741_v4 = vadd.f32 %v1738_v12, %v3006_v63 }
 0x837   :  { %1743 = vst [vmem:[#allocation22 + $0x8] sm:$0xff] %v1741_v4 }
 0x838   :  { %1756 = dma.vmem_to_hbm [thread:$0]  %s1749_s20, 256, %s1751_s9, [#allocation4], %s2726_s21, %s2726_s21, %s2727_s22  }
 0x839   :  { %2723 = dma.done.wait [#allocation4], 256  }
 0x83a   :  { %2724 = vsyncadd [#allocation4], 4294967040 }
 0x83b   :  { %1761 = vsyncpa [#allocation3], 1 }
 0x83c   :  { %1762 = vsyncpa [#allocation6], 1 }
 0x83d   :  { %1763 = vsyncpa [#allocation9], 1 }
 0x83e   :  { %1764 = vsyncpa [#allocation12], 1 }
 0x83f   :  { %1765 = vsyncpa [#allocation15], 1 }
 0x840   :  { %1766 = vsyncpa [#allocation18], 1 }
 0x841   :  { %1767 = vsyncpa [#allocation21], 1 }
 0x842   :  { %1768 = vsyncpa [#allocation4], 1 }

</bundles_post_ra>
